<compile_context>
chip_gen: v5e
topology: v5e:2x2
jax: 0.10.0
libtpu: 0.0.40
codegen_flags: <defaults>
</compile_context>

<pallas_src>
import jax
import jax.numpy as jnp
from jax.experimental import pallas as pl
from jax.experimental.pallas import tpu as pltpu


# ----------------------------------------------------------------------------
# In-kernel helpers
# ----------------------------------------------------------------------------
def _shift_down(z):
    """y[i] = z[i-1], y[0] = 0 (zero halo row above)."""
    rows = jax.lax.broadcasted_iota(jnp.int32, z.shape, 0)
    return jnp.where(rows == 0, 0.0, pltpu.roll(z, shift=1, axis=0))


def _shift_up(z):
    """y[i] = z[i+1], y[last] = 0 (zero halo row below)."""
    h = z.shape[0]
    rows = jax.lax.broadcasted_iota(jnp.int32, z.shape, 0)
    return jnp.where(rows == h - 1, 0.0, pltpu.roll(z, shift=h - 1, axis=0))


def _banded_conv_pair(z_even, z_odd, band_ref):
    """3x3 conv (pad=1) on parity-split rows via width-banded MXU matmuls.

    band_ref[dy] is the (W*Cz, W*Cout) band matrix for vertical tap dy; the
    horizontal taps and the left/right zero halo are baked into the band, the
    top/bottom zero halo comes from the masked row shifts.

    Even output row 2i   uses input rows 2i-1, 2i,   2i+1 -> z_odd[i-1], z_even[i], z_odd[i]
    Odd  output row 2i+1 uses input rows 2i,   2i+1, 2i+2 -> z_even[i], z_odd[i],  z_even[i+1]
    """
    f32 = jnp.float32
    b0 = band_ref[0]
    b1 = band_ref[1]
    b2 = band_ref[2]
    even = (jnp.dot(_shift_down(z_odd), b0, preferred_element_type=f32)
            + jnp.dot(z_even, b1, preferred_element_type=f32)
            + jnp.dot(z_odd, b2, preferred_element_type=f32))
    odd = (jnp.dot(z_even, b0, preferred_element_type=f32)
           + jnp.dot(z_odd, b1, preferred_element_type=f32)
           + jnp.dot(_shift_up(z_even), b2, preferred_element_type=f32))
    return even, odd


def _up_block_kernel(x1_ref, x2_ref, u_ref, ub_ref,
                     a1a_ref, a1b_ref, s1_ref, t1_ref,
                     b2_ref, s2_ref, t2_ref, o_ref):
    """One batch element per grid step.

    x1_ref : (1, H1, W1*C1)      low-res input, width*channels in lanes
    x2_ref : (1, H1, 2*W*C2)     skip input, row i = [image row 2i | row 2i+1]
    u_ref  : (2, W1*C1, W*C1)    ConvTranspose2d band matrices (even/odd rows)
    ub_ref : (1, W*C1)           ConvTranspose2d bias, tiled across W
    a1a_ref: (3, W*C2, W*Co)     conv1 band matrices, taps hitting x2 channels
    a1b_ref: (3, W*C1, W*Co)     conv1 band matrices, taps hitting upsampled x1
    s1/t1  : (1, W*Co)           folded BN1 scale / bias (incl. conv1 bias)
    b2_ref : (3, W*Co, W*Co)     conv2 band matrices
    s2/t2  : (1, W*Co)           folded BN2 scale / bias
    o_ref  : (1, H1, 2*W*Co)     output, row i = [image row 2i | row 2i+1]
    """
    f32 = jnp.float32
    wco = s1_ref.shape[1]                 # W * Cout  (one parity's lanes)
    wc2 = x2_ref.shape[2] // 2            # W * C2

    x1 = x1_ref[0]                        # (H1, W1*C1)
    x2_even = x2_ref[0, :, :wc2]          # image rows 2i
    x2_odd = x2_ref[0, :, wc2:]           # image rows 2i+1

    # ---- ConvTranspose2d(C1, C1, 2, stride=2): even/odd output rows are two
    # independent width-band matmuls of the same x1 row (no interleaving). ----
    up_b = ub_ref[...]
    up_even = jnp.dot(x1, u_ref[0], preferred_element_type=f32) + up_b
    up_odd = jnp.dot(x1, u_ref[1], preferred_element_type=f32) + up_b

    # ---- conv1 over the channel concat [x2, up]:
    #      conv(cat) = conv(x2; w1[:, :, :C2]) + conv(up; w1[:, :, C2:]) ----
    e_a, o_a = _banded_conv_pair(x2_even, x2_odd, a1a_ref)
    e_b, o_b = _banded_conv_pair(up_even, up_odd, a1b_ref)
    s1 = s1_ref[...]
    t1 = t1_ref[...]
    y1_even = jnp.maximum((e_a + e_b) * s1 + t1, 0.0)     # BN1 (folded) + ReLU
    y1_odd = jnp.maximum((o_a + o_b) * s1 + t1, 0.0)

    # ---- conv2 -> BN2 -> ReLU, lane-dense stores ----
    e2, o2 = _banded_conv_pair(y1_even, y1_odd, b2_ref)
    s2 = s2_ref[...]
    t2 = t2_ref[...]
    o_ref[0, :, :wco] = jnp.maximum(e2 * s2 + t2, 0.0).astype(o_ref.dtype)
    o_ref[0, :, wco:] = jnp.maximum(o2 * s2 + t2, 0.0).astype(o_ref.dtype)


# ----------------------------------------------------------------------------
# Parameter algebra (JAX glue, runs once under jit)
# ----------------------------------------------------------------------------
def _conv_width_band(w, W):
    """w: (3, 3, Cin, Cout) HWIO -> (3, W*Cin, W*Cout) width-band matrices.

    mats[dy][xs*Cin + ci, x*Cout + co] = w[dy, dx, ci, co] with xs = x + dx - 1
    if 0 <= xs < W, else 0 (left/right zero halo baked in).
    """
    Cin, Cout = w.shape[2], w.shape[3]
    x = jnp.arange(W)
    # S[dx, xs, x] = 1 where xs == x + dx - 1
    S = (x[None, :, None] == (x[None, None, :]
                              + jnp.arange(3)[:, None, None] - 1)).astype(w.dtype)
    m = jnp.einsum('dax,ydio->yaixo', S, w)        # (3, W, Cin, W, Cout)
    return m.reshape(3, W * Cin, W * Cout)


def _deconv_width_band(wu, W1):
    """wu: (C1, C1, 2, 2) PyTorch ConvTranspose2d weight (in, out, kh, kw)
       -> (2, W1*C1, 2*W1*C1): U[di][j*C1+ci, (2j+dj)*C1+co] = wu[ci, co, di, dj]."""
    C1 = wu.shape[0]
    Wout = 2 * W1
    j = jnp.arange(W1)
    X = jnp.arange(Wout)
    # T[dj, j, X] = 1 where X == 2*j + dj
    T = (X[None, None, :] == (2 * j[None, :, None]
                              + jnp.arange(2)[:, None, None])).astype(wu.dtype)
    U = jnp.einsum('djX,ioyd->yjiXo', T, wu)       # (2, W1, C1, Wout, C1)
    return U.reshape(2, W1 * C1, Wout * C1)


def _fold_bn(conv_bias, gamma, beta, running_mean, running_var, eps=1e-5):
    """Fold conv bias + eval-mode BatchNorm into a per-channel scale/bias."""
    scale = gamma / jnp.sqrt(running_var + eps)
    bias = (conv_bias - running_mean) * scale + beta
    return scale, bias


def _pad_skip(x2, H, W):
    """Mirror the module's F.pad of the skip connection (no-op when sizes match)."""
    diffX = H - x2.shape[1]     # module: diffX = x1.size(2) - x2.size(2)
    diffY = W - x2.shape[2]
    return jnp.pad(x2, ((0, 0),
                        (diffY // 2, diffY - diffY // 2),
                        (diffX // 2, diffX - diffX // 2),
                        (0, 0)))


# ----------------------------------------------------------------------------
# Wrapper
# ----------------------------------------------------------------------------
@jax.jit
def up_forward(x1, x2, wu, bu, w1, s1, b1, w2, s2, b2):
    """x1: (N, H1, W1, C1) NHWC, x2: (N, ~2H1, ~2W1, C2) NHWC.
    wu/bu: ConvTranspose2d(C1, C1, 2, stride=2) weight (in,out,kh,kw) and bias.
    w1: (3,3,C2+C1,Co) HWIO, s1/b1: folded BN1 scale/bias; w2/s2/b2: layer 2.
    Returns (N, 2*H1, 2*W1, Co)."""
    N, H1, W1, C1 = x1.shape
    H, W = 2 * H1, 2 * W1
    C2 = x2.shape[-1]
    Co = w1.shape[-1]
    assert w1.shape == (3, 3, C1 + C2, Co)

    x2p = _pad_skip(x2, H, W)                       # (N, H, W, C2)

    # Band matrices / folded per-lane vectors (tiny, built once under jit).
    U = _deconv_width_band(wu, W1)                  # (2, W1*C1, W*C1)
    bu_t = jnp.tile(bu, W).reshape(1, W * C1)
    A1a = _conv_width_band(w1[:, :, :C2, :], W)     # conv1 taps hitting x2
    A1b = _conv_width_band(w1[:, :, C2:, :], W)     # conv1 taps hitting up(x1)
    B2 = _conv_width_band(w2, W)
    s1_t = jnp.tile(s1, W).reshape(1, W * Co)
    t1_t = jnp.tile(b1, W).reshape(1, W * Co)
    s2_t = jnp.tile(s2, W).reshape(1, W * Co)
    t2_t = jnp.tile(b2, W).reshape(1, W * Co)

    # Free (contiguous) relayouts: parity-in-lanes views, no data movement.
    x1r = x1.reshape(N, H1, W1 * C1)
    x2r = x2p.reshape(N, H1, 2 * W * C2)            # row i = [row 2i | row 2i+1]

    n3 = lambda n: (n, 0, 0)
    c2 = lambda n: (0, 0)
    c3 = lambda n: (0, 0, 0)

    grid_spec = pltpu.PrefetchScalarGridSpec(
        num_scalar_prefetch=0,
        grid=(N,),
        in_specs=[
            pl.BlockSpec((1, H1, W1 * C1), n3),         # x1
            pl.BlockSpec((1, H1, 2 * W * C2), n3),      # x2 (parity in lanes)
            pl.BlockSpec((2, W1 * C1, W * C1), c3),     # deconv bands
            pl.BlockSpec((1, W * C1), c2),              # deconv bias (tiled)
            pl.BlockSpec((3, W * C2, W * Co), c3),      # conv1 bands (x2 part)
            pl.BlockSpec((3, W * C1, W * Co), c3),      # conv1 bands (up part)
            pl.BlockSpec((1, W * Co), c2),              # s1
            pl.BlockSpec((1, W * Co), c2),              # t1
            pl.BlockSpec((3, W * Co, W * Co), c3),      # conv2 bands
            pl.BlockSpec((1, W * Co), c2),              # s2
            pl.BlockSpec((1, W * Co), c2),              # t2
        ],
        out_specs=pl.BlockSpec((1, H1, 2 * W * Co), n3),
    )

    out = pl.pallas_call(
        _up_block_kernel,
        out_shape=jax.ShapeDtypeStruct((N, H1, 2 * W * Co), x1.dtype),
        grid_spec=grid_spec,
        compiler_params=pltpu.CompilerParams(
            dimension_semantics=("parallel",)),
    )(x1r, x2r, U, bu_t, A1a, A1b, s1_t, t1_t, B2, s2_t, t2_t)

    # (N, H1, 2*W*Co) -> (N, H, W, Co) is a contiguous (free) reshape.
    return out.reshape(N, H, W, Co)


# ----------------------------------------------------------------------------
# Pure-JAX reference (HIGHEST precision) for the correctness check
# ----------------------------------------------------------------------------
def _reference(x1, x2, wu, bu, w1, s1, b1, w2, s2, b2):
    N, H1, W1, C1 = x1.shape
    hp = jax.lax.Precision.HIGHEST
    # ConvTranspose2d(C1, C1, 2, stride=2): out[n, 2i+f, 2j+g, o] =
    #   sum_c x1[n, i, j, c] * wu[c, o, f, g] + bu[o]
    t = jnp.einsum('nijc,cofg->nifjgo', x1, wu, precision=hp)
    up = t.reshape(N, 2 * H1, 2 * W1, C1) + bu
    x2p = _pad_skip(x2, 2 * H1, 2 * W1)
    x = jnp.concatenate([x2p, up], axis=-1)          # torch.cat([x2, x1], dim=1)
    dn = ("NHWC", "HWIO", "NHWC")
    y = jax.lax.conv_general_dilated(x, w1, (1, 1), "SAME",
                                     dimension_numbers=dn, precision=hp)
    y = jnp.maximum(y * s1 + b1, 0.0)
    y = jax.lax.conv_general_dilated(y, w2, (1, 1), "SAME",
                                     dimension_numbers=dn, precision=hp)
    y = jnp.maximum(y * s2 + b2, 0.0)
    return y


if __name__ == "__main__":
    # up(in_ch=16, out_ch=8): x1 is the low-res map (in_ch//2 channels),
    # x2 the skip connection (in_ch//2 channels) at 2x spatial size.
    N, in_ch, out_ch = 2, 16, 8
    C1 = in_ch // 2
    C2 = in_ch - C1
    H1 = W1 = 8
    H, W = 2 * H1, 2 * W1

    key = jax.random.PRNGKey(0)
    ks = jax.random.split(key, 16)

    x1 = jax.random.normal(ks[0], (N, H1, W1, C1), jnp.float32)
    x2 = jax.random.normal(ks[1], (N, H, W, C2), jnp.float32)

    # ConvTranspose2d(in_ch//2, in_ch//2, 2, stride=2) params (torch layout).
    wu = 0.2 * jax.random.normal(ks[2], (C1, C1, 2, 2), jnp.float32)
    bu = 0.1 * jax.random.normal(ks[3], (C1,), jnp.float32)

    # double_conv layer 1: Conv2d(3x3, pad=1) + BatchNorm2d (eval stats).
    w1 = 0.1 * jax.random.normal(ks[4], (3, 3, in_ch, out_ch), jnp.float32)
    cb1 = 0.1 * jax.random.normal(ks[5], (out_ch,), jnp.float32)
    g1 = 0.5 + jax.random.uniform(ks[6], (out_ch,), jnp.float32)
    be1 = 0.1 * jax.random.normal(ks[7], (out_ch,), jnp.float32)
    rm1 = 0.1 * jax.random.normal(ks[8], (out_ch,), jnp.float32)
    rv1 = 0.5 + jax.random.uniform(ks[9], (out_ch,), jnp.float32)

    # double_conv layer 2.
    w2 = 0.1 * jax.random.normal(ks[10], (3, 3, out_ch, out_ch), jnp.float32)
    cb2 = 0.1 * jax.random.normal(ks[11], (out_ch,), jnp.float32)
    g2 = 0.5 + jax.random.uniform(ks[12], (out_ch,), jnp.float32)
    be2 = 0.1 * jax.random.normal(ks[13], (out_ch,), jnp.float32)
    rm2 = 0.1 * jax.random.normal(ks[14], (out_ch,), jnp.float32)
    rv2 = 0.5 + jax.random.uniform(ks[15], (out_ch,), jnp.float32)

    s1, b1 = _fold_bn(cb1, g1, be1, rm1, rv1)
    s2, b2 = _fold_bn(cb2, g2, be2, rm2, rv2)

    out = up_forward(x1, x2, wu, bu, w1, s1, b1, w2, s2, b2)
    out = jax.block_until_ready(out)

    ref = _reference(x1, x2, wu, bu, w1, s1, b1, w2, s2, b2)
    assert out.shape == (N, H, W, out_ch)
    err = float(jnp.max(jnp.abs(out - ref)))
    # Tolerance covers TPU MXU matmul precision vs. the HIGHEST-precision
    # reference; structural bugs produce errors orders of magnitude larger.
    assert jnp.allclose(out, ref, atol=3e-2, rtol=3e-2), err

    print("KERNEL_OK")
</pallas_src>

<mosaic_0001>
module attributes {stable_mosaic.version = 11 : i64} {
  func.func @_up_block_kernel(%arg0: i32, %arg1: memref<1x8x64xf32, #tpu.memory_space<vmem>>, %arg2: memref<1x8x256xf32, #tpu.memory_space<vmem>>, %arg3: memref<2x64x128xf32, #tpu.memory_space<vmem>>, %arg4: memref<1x128xf32, #tpu.memory_space<vmem>>, %arg5: memref<3x128x128xf32, #tpu.memory_space<vmem>>, %arg6: memref<3x128x128xf32, #tpu.memory_space<vmem>>, %arg7: memref<1x128xf32, #tpu.memory_space<vmem>>, %arg8: memref<1x128xf32, #tpu.memory_space<vmem>>, %arg9: memref<3x128x128xf32, #tpu.memory_space<vmem>>, %arg10: memref<1x128xf32, #tpu.memory_space<vmem>>, %arg11: memref<1x128xf32, #tpu.memory_space<vmem>>, %arg12: memref<1x8x256xf32, #tpu.memory_space<vmem>>) attributes {dimension_semantics = [#tpu.dimension_semantics<parallel>], iteration_bounds = array<i64: 2>, scalar_prefetch = 0 : i64, scratch_operands = 0 : i64, tpu.core_type = #tpu.core_type<tc>, window_params = [{transform_indices = @transform_0, window_bounds = array<i64: 1, 8, 64>}, {transform_indices = @transform_1, window_bounds = array<i64: 1, 8, 256>}, {pipeline_mode = #tpu.pipeline_mode<synchronous>, transform_indices = @transform_2, window_bounds = array<i64: 2, 64, 128>}, {pipeline_mode = #tpu.pipeline_mode<synchronous>, transform_indices = @transform_3, window_bounds = array<i64: 1, 128>}, {pipeline_mode = #tpu.pipeline_mode<synchronous>, transform_indices = @transform_4, window_bounds = array<i64: 3, 128, 128>}, {pipeline_mode = #tpu.pipeline_mode<synchronous>, transform_indices = @transform_5, window_bounds = array<i64: 3, 128, 128>}, {pipeline_mode = #tpu.pipeline_mode<synchronous>, transform_indices = @transform_6, window_bounds = array<i64: 1, 128>}, {pipeline_mode = #tpu.pipeline_mode<synchronous>, transform_indices = @transform_7, window_bounds = array<i64: 1, 128>}, {pipeline_mode = #tpu.pipeline_mode<synchronous>, transform_indices = @transform_8, window_bounds = array<i64: 3, 128, 128>}, {pipeline_mode = #tpu.pipeline_mode<synchronous>, transform_indices = @transform_9, window_bounds = array<i64: 1, 128>}, {pipeline_mode = #tpu.pipeline_mode<synchronous>, transform_indices = @transform_10, window_bounds = array<i64: 1, 128>}, {transform_indices = @transform_11, window_bounds = array<i64: 1, 8, 256>}]} {
    %c0 = arith.constant 0 : index
    %c0_0 = arith.constant 0 : index
    %c0_1 = arith.constant 0 : index
    %0 = vector.load %arg1[%c0, %c0_0, %c0_1] : memref<1x8x64xf32, #tpu.memory_space<vmem>>, vector<1x8x64xf32>
    %1 = vector.shape_cast %0 : vector<1x8x64xf32> to vector<8x64xf32>
    %c0_2 = arith.constant 0 : index
    %c0_3 = arith.constant 0 : index
    %c0_4 = arith.constant 0 : index
    %2 = vector.load %arg2[%c0_2, %c0_3, %c0_4] : memref<1x8x256xf32, #tpu.memory_space<vmem>>, vector<1x8x128xf32>
    %3 = vector.shape_cast %2 : vector<1x8x128xf32> to vector<8x128xf32>
    %c0_5 = arith.constant 0 : index
    %c0_6 = arith.constant 0 : index
    %c128 = arith.constant 128 : index
    %4 = vector.load %arg2[%c0_5, %c0_6, %c128] : memref<1x8x256xf32, #tpu.memory_space<vmem>>, vector<1x8x128xf32>
    %5 = vector.shape_cast %4 : vector<1x8x128xf32> to vector<8x128xf32>
    %c0_7 = arith.constant 0 : index
    %c0_8 = arith.constant 0 : index
    %6 = vector.load %arg4[%c0_7, %c0_8] : memref<1x128xf32, #tpu.memory_space<vmem>>, vector<1x128xf32>
    %c0_9 = arith.constant 0 : index
    %c0_10 = arith.constant 0 : index
    %c0_11 = arith.constant 0 : index
    %7 = vector.load %arg3[%c0_9, %c0_10, %c0_11] : memref<2x64x128xf32, #tpu.memory_space<vmem>>, vector<1x64x128xf32>
    %8 = vector.shape_cast %7 : vector<1x64x128xf32> to vector<64x128xf32>
    %cst = arith.constant dense<0.000000e+00> : vector<8x128xf32>
    %9 = tpu.matmul %1, %8, %cst {dimension_numbers = #tpu.dot_dimension_numbers<[1], [0], [0], [1], [0, 0, 1, 1], [], []>} : vector<8x64xf32>, vector<64x128xf32>, vector<8x128xf32> -> vector<8x128xf32>
    %10 = vector.broadcast %6 : vector<1x128xf32> to vector<8x128xf32>
    %11 = arith.addf %9, %10 : vector<8x128xf32>
    %c1 = arith.constant 1 : index
    %c0_12 = arith.constant 0 : index
    %c0_13 = arith.constant 0 : index
    %12 = vector.load %arg3[%c1, %c0_12, %c0_13] : memref<2x64x128xf32, #tpu.memory_space<vmem>>, vector<1x64x128xf32>
    %13 = vector.shape_cast %12 : vector<1x64x128xf32> to vector<64x128xf32>
    %cst_14 = arith.constant dense<0.000000e+00> : vector<8x128xf32>
    %14 = tpu.matmul %1, %13, %cst_14 {dimension_numbers = #tpu.dot_dimension_numbers<[1], [0], [0], [1], [0, 0, 1, 1], [], []>} : vector<8x64xf32>, vector<64x128xf32>, vector<8x128xf32> -> vector<8x128xf32>
    %15 = vector.broadcast %6 : vector<1x128xf32> to vector<8x128xf32>
    %16 = arith.addf %14, %15 : vector<8x128xf32>
    %c0_15 = arith.constant 0 : index
    %c0_16 = arith.constant 0 : index
    %c0_17 = arith.constant 0 : index
    %17 = vector.load %arg5[%c0_15, %c0_16, %c0_17] : memref<3x128x128xf32, #tpu.memory_space<vmem>>, vector<1x128x128xf32>
    %18 = vector.shape_cast %17 : vector<1x128x128xf32> to vector<128x128xf32>
    %c1_18 = arith.constant 1 : index
    %c0_19 = arith.constant 0 : index
    %c0_20 = arith.constant 0 : index
    %19 = vector.load %arg5[%c1_18, %c0_19, %c0_20] : memref<3x128x128xf32, #tpu.memory_space<vmem>>, vector<1x128x128xf32>
    %20 = vector.shape_cast %19 : vector<1x128x128xf32> to vector<128x128xf32>
    %c2 = arith.constant 2 : index
    %c0_21 = arith.constant 0 : index
    %c0_22 = arith.constant 0 : index
    %21 = vector.load %arg5[%c2, %c0_21, %c0_22] : memref<3x128x128xf32, #tpu.memory_space<vmem>>, vector<1x128x128xf32>
    %22 = vector.shape_cast %21 : vector<1x128x128xf32> to vector<128x128xf32>
    %23 = tpu.iota {dimensions = array<i32: 0>} : vector<8x128xi32>
    %c0_i32 = arith.constant 0 : i32
    %24 = vector.broadcast %c0_i32 : i32 to vector<8x128xi32>
    %25 = arith.cmpi eq, %23, %24 : vector<8x128xi32>
    %c1_i32 = arith.constant 1 : i32
    %26 = tpu.dynamic_rotate %5 by %c1_i32 dim 0 : vector<8x128xf32>, i32 -> vector<8x128xf32>
    %cst_23 = arith.constant 0.000000e+00 : f32
    %27 = vector.broadcast %cst_23 : f32 to vector<8x128xf32>
    %28 = arith.select %25, %27, %26 : vector<8x128xi1>, vector<8x128xf32>
    %cst_24 = arith.constant dense<0.000000e+00> : vector<8x128xf32>
    %29 = tpu.matmul %28, %18, %cst_24 {dimension_numbers = #tpu.dot_dimension_numbers<[1], [0], [0], [1], [0, 0, 1, 1], [], []>} : vector<8x128xf32>, vector<128x128xf32>, vector<8x128xf32> -> vector<8x128xf32>
    %cst_25 = arith.constant dense<0.000000e+00> : vector<8x128xf32>
    %30 = tpu.matmul %3, %20, %cst_25 {dimension_numbers = #tpu.dot_dimension_numbers<[1], [0], [0], [1], [0, 0, 1, 1], [], []>} : vector<8x128xf32>, vector<128x128xf32>, vector<8x128xf32> -> vector<8x128xf32>
    %31 = arith.addf %29, %30 : vector<8x128xf32>
    %cst_26 = arith.constant dense<0.000000e+00> : vector<8x128xf32>
    %32 = tpu.matmul %5, %22, %cst_26 {dimension_numbers = #tpu.dot_dimension_numbers<[1], [0], [0], [1], [0, 0, 1, 1], [], []>} : vector<8x128xf32>, vector<128x128xf32>, vector<8x128xf32> -> vector<8x128xf32>
    %33 = arith.addf %31, %32 : vector<8x128xf32>
    %cst_27 = arith.constant dense<0.000000e+00> : vector<8x128xf32>
    %34 = tpu.matmul %3, %18, %cst_27 {dimension_numbers = #tpu.dot_dimension_numbers<[1], [0], [0], [1], [0, 0, 1, 1], [], []>} : vector<8x128xf32>, vector<128x128xf32>, vector<8x128xf32> -> vector<8x128xf32>
    %cst_28 = arith.constant dense<0.000000e+00> : vector<8x128xf32>
    %35 = tpu.matmul %5, %20, %cst_28 {dimension_numbers = #tpu.dot_dimension_numbers<[1], [0], [0], [1], [0, 0, 1, 1], [], []>} : vector<8x128xf32>, vector<128x128xf32>, vector<8x128xf32> -> vector<8x128xf32>
    %36 = arith.addf %34, %35 : vector<8x128xf32>
    %37 = tpu.iota {dimensions = array<i32: 0>} : vector<8x128xi32>
    %c7_i32 = arith.constant 7 : i32
    %38 = vector.broadcast %c7_i32 : i32 to vector<8x128xi32>
    %39 = arith.cmpi eq, %37, %38 : vector<8x128xi32>
    %c7_i32_29 = arith.constant 7 : i32
    %40 = tpu.dynamic_rotate %3 by %c7_i32_29 dim 0 : vector<8x128xf32>, i32 -> vector<8x128xf32>
    %cst_30 = arith.constant 0.000000e+00 : f32
    %41 = vector.broadcast %cst_30 : f32 to vector<8x128xf32>
    %42 = arith.select %39, %41, %40 : vector<8x128xi1>, vector<8x128xf32>
    %cst_31 = arith.constant dense<0.000000e+00> : vector<8x128xf32>
    %43 = tpu.matmul %42, %22, %cst_31 {dimension_numbers = #tpu.dot_dimension_numbers<[1], [0], [0], [1], [0, 0, 1, 1], [], []>} : vector<8x128xf32>, vector<128x128xf32>, vector<8x128xf32> -> vector<8x128xf32>
    %44 = arith.addf %36, %43 : vector<8x128xf32>
    %c0_32 = arith.constant 0 : index
    %c0_33 = arith.constant 0 : index
    %c0_34 = arith.constant 0 : index
    %45 = vector.load %arg6[%c0_32, %c0_33, %c0_34] : memref<3x128x128xf32, #tpu.memory_space<vmem>>, vector<1x128x128xf32>
    %46 = vector.shape_cast %45 : vector<1x128x128xf32> to vector<128x128xf32>
    %c1_35 = arith.constant 1 : index
    %c0_36 = arith.constant 0 : index
    %c0_37 = arith.constant 0 : index
    %47 = vector.load %arg6[%c1_35, %c0_36, %c0_37] : memref<3x128x128xf32, #tpu.memory_space<vmem>>, vector<1x128x128xf32>
    %48 = vector.shape_cast %47 : vector<1x128x128xf32> to vector<128x128xf32>
    %c2_38 = arith.constant 2 : index
    %c0_39 = arith.constant 0 : index
    %c0_40 = arith.constant 0 : index
    %49 = vector.load %arg6[%c2_38, %c0_39, %c0_40] : memref<3x128x128xf32, #tpu.memory_space<vmem>>, vector<1x128x128xf32>
    %50 = vector.shape_cast %49 : vector<1x128x128xf32> to vector<128x128xf32>
    %51 = tpu.iota {dimensions = array<i32: 0>} : vector<8x128xi32>
    %c0_i32_41 = arith.constant 0 : i32
    %52 = vector.broadcast %c0_i32_41 : i32 to vector<8x128xi32>
    %53 = arith.cmpi eq, %51, %52 : vector<8x128xi32>
    %c1_i32_42 = arith.constant 1 : i32
    %54 = tpu.dynamic_rotate %16 by %c1_i32_42 dim 0 : vector<8x128xf32>, i32 -> vector<8x128xf32>
    %cst_43 = arith.constant 0.000000e+00 : f32
    %55 = vector.broadcast %cst_43 : f32 to vector<8x128xf32>
    %56 = arith.select %53, %55, %54 : vector<8x128xi1>, vector<8x128xf32>
    %cst_44 = arith.constant dense<0.000000e+00> : vector<8x128xf32>
    %57 = tpu.matmul %56, %46, %cst_44 {dimension_numbers = #tpu.dot_dimension_numbers<[1], [0], [0], [1], [0, 0, 1, 1], [], []>} : vector<8x128xf32>, vector<128x128xf32>, vector<8x128xf32> -> vector<8x128xf32>
    %cst_45 = arith.constant dense<0.000000e+00> : vector<8x128xf32>
    %58 = tpu.matmul %11, %48, %cst_45 {dimension_numbers = #tpu.dot_dimension_numbers<[1], [0], [0], [1], [0, 0, 1, 1], [], []>} : vector<8x128xf32>, vector<128x128xf32>, vector<8x128xf32> -> vector<8x128xf32>
    %59 = arith.addf %57, %58 : vector<8x128xf32>
    %cst_46 = arith.constant dense<0.000000e+00> : vector<8x128xf32>
    %60 = tpu.matmul %16, %50, %cst_46 {dimension_numbers = #tpu.dot_dimension_numbers<[1], [0], [0], [1], [0, 0, 1, 1], [], []>} : vector<8x128xf32>, vector<128x128xf32>, vector<8x128xf32> -> vector<8x128xf32>
    %61 = arith.addf %59, %60 : vector<8x128xf32>
    %cst_47 = arith.constant dense<0.000000e+00> : vector<8x128xf32>
    %62 = tpu.matmul %11, %46, %cst_47 {dimension_numbers = #tpu.dot_dimension_numbers<[1], [0], [0], [1], [0, 0, 1, 1], [], []>} : vector<8x128xf32>, vector<128x128xf32>, vector<8x128xf32> -> vector<8x128xf32>
    %cst_48 = arith.constant dense<0.000000e+00> : vector<8x128xf32>
    %63 = tpu.matmul %16, %48, %cst_48 {dimension_numbers = #tpu.dot_dimension_numbers<[1], [0], [0], [1], [0, 0, 1, 1], [], []>} : vector<8x128xf32>, vector<128x128xf32>, vector<8x128xf32> -> vector<8x128xf32>
    %64 = arith.addf %62, %63 : vector<8x128xf32>
    %65 = tpu.iota {dimensions = array<i32: 0>} : vector<8x128xi32>
    %c7_i32_49 = arith.constant 7 : i32
    %66 = vector.broadcast %c7_i32_49 : i32 to vector<8x128xi32>
    %67 = arith.cmpi eq, %65, %66 : vector<8x128xi32>
    %c7_i32_50 = arith.constant 7 : i32
    %68 = tpu.dynamic_rotate %11 by %c7_i32_50 dim 0 : vector<8x128xf32>, i32 -> vector<8x128xf32>
    %cst_51 = arith.constant 0.000000e+00 : f32
    %69 = vector.broadcast %cst_51 : f32 to vector<8x128xf32>
    %70 = arith.select %67, %69, %68 : vector<8x128xi1>, vector<8x128xf32>
    %cst_52 = arith.constant dense<0.000000e+00> : vector<8x128xf32>
    %71 = tpu.matmul %70, %50, %cst_52 {dimension_numbers = #tpu.dot_dimension_numbers<[1], [0], [0], [1], [0, 0, 1, 1], [], []>} : vector<8x128xf32>, vector<128x128xf32>, vector<8x128xf32> -> vector<8x128xf32>
    %72 = arith.addf %64, %71 : vector<8x128xf32>
    %c0_53 = arith.constant 0 : index
    %c0_54 = arith.constant 0 : index
    %73 = vector.load %arg7[%c0_53, %c0_54] : memref<1x128xf32, #tpu.memory_space<vmem>>, vector<1x128xf32>
    %c0_55 = arith.constant 0 : index
    %c0_56 = arith.constant 0 : index
    %74 = vector.load %arg8[%c0_55, %c0_56] : memref<1x128xf32, #tpu.memory_space<vmem>>, vector<1x128xf32>
    %75 = arith.addf %33, %61 : vector<8x128xf32>
    %76 = vector.broadcast %73 : vector<1x128xf32> to vector<8x128xf32>
    %77 = arith.mulf %75, %76 : vector<8x128xf32>
    %78 = vector.broadcast %74 : vector<1x128xf32> to vector<8x128xf32>
    %79 = arith.addf %77, %78 : vector<8x128xf32>
    %cst_57 = arith.constant 0.000000e+00 : f32
    %80 = vector.broadcast %cst_57 : f32 to vector<8x128xf32>
    %81 = arith.maximumf %79, %80 : vector<8x128xf32>
    %82 = arith.addf %44, %72 : vector<8x128xf32>
    %83 = vector.broadcast %73 : vector<1x128xf32> to vector<8x128xf32>
    %84 = arith.mulf %82, %83 : vector<8x128xf32>
    %85 = vector.broadcast %74 : vector<1x128xf32> to vector<8x128xf32>
    %86 = arith.addf %84, %85 : vector<8x128xf32>
    %cst_58 = arith.constant 0.000000e+00 : f32
    %87 = vector.broadcast %cst_58 : f32 to vector<8x128xf32>
    %88 = arith.maximumf %86, %87 : vector<8x128xf32>
    %c0_59 = arith.constant 0 : index
    %c0_60 = arith.constant 0 : index
    %c0_61 = arith.constant 0 : index
    %89 = vector.load %arg9[%c0_59, %c0_60, %c0_61] : memref<3x128x128xf32, #tpu.memory_space<vmem>>, vector<1x128x128xf32>
    %90 = vector.shape_cast %89 : vector<1x128x128xf32> to vector<128x128xf32>
    %c1_62 = arith.constant 1 : index
    %c0_63 = arith.constant 0 : index
    %c0_64 = arith.constant 0 : index
    %91 = vector.load %arg9[%c1_62, %c0_63, %c0_64] : memref<3x128x128xf32, #tpu.memory_space<vmem>>, vector<1x128x128xf32>
    %92 = vector.shape_cast %91 : vector<1x128x128xf32> to vector<128x128xf32>
    %c2_65 = arith.constant 2 : index
    %c0_66 = arith.constant 0 : index
    %c0_67 = arith.constant 0 : index
    %93 = vector.load %arg9[%c2_65, %c0_66, %c0_67] : memref<3x128x128xf32, #tpu.memory_space<vmem>>, vector<1x128x128xf32>
    %94 = vector.shape_cast %93 : vector<1x128x128xf32> to vector<128x128xf32>
    %95 = tpu.iota {dimensions = array<i32: 0>} : vector<8x128xi32>
    %c0_i32_68 = arith.constant 0 : i32
    %96 = vector.broadcast %c0_i32_68 : i32 to vector<8x128xi32>
    %97 = arith.cmpi eq, %95, %96 : vector<8x128xi32>
    %c1_i32_69 = arith.constant 1 : i32
    %98 = tpu.dynamic_rotate %88 by %c1_i32_69 dim 0 : vector<8x128xf32>, i32 -> vector<8x128xf32>
    %cst_70 = arith.constant 0.000000e+00 : f32
    %99 = vector.broadcast %cst_70 : f32 to vector<8x128xf32>
    %100 = arith.select %97, %99, %98 : vector<8x128xi1>, vector<8x128xf32>
    %cst_71 = arith.constant dense<0.000000e+00> : vector<8x128xf32>
    %101 = tpu.matmul %100, %90, %cst_71 {dimension_numbers = #tpu.dot_dimension_numbers<[1], [0], [0], [1], [0, 0, 1, 1], [], []>} : vector<8x128xf32>, vector<128x128xf32>, vector<8x128xf32> -> vector<8x128xf32>
    %cst_72 = arith.constant dense<0.000000e+00> : vector<8x128xf32>
    %102 = tpu.matmul %81, %92, %cst_72 {dimension_numbers = #tpu.dot_dimension_numbers<[1], [0], [0], [1], [0, 0, 1, 1], [], []>} : vector<8x128xf32>, vector<128x128xf32>, vector<8x128xf32> -> vector<8x128xf32>
    %103 = arith.addf %101, %102 : vector<8x128xf32>
    %cst_73 = arith.constant dense<0.000000e+00> : vector<8x128xf32>
    %104 = tpu.matmul %88, %94, %cst_73 {dimension_numbers = #tpu.dot_dimension_numbers<[1], [0], [0], [1], [0, 0, 1, 1], [], []>} : vector<8x128xf32>, vector<128x128xf32>, vector<8x128xf32> -> vector<8x128xf32>
    %105 = arith.addf %103, %104 : vector<8x128xf32>
    %cst_74 = arith.constant dense<0.000000e+00> : vector<8x128xf32>
    %106 = tpu.matmul %81, %90, %cst_74 {dimension_numbers = #tpu.dot_dimension_numbers<[1], [0], [0], [1], [0, 0, 1, 1], [], []>} : vector<8x128xf32>, vector<128x128xf32>, vector<8x128xf32> -> vector<8x128xf32>
    %cst_75 = arith.constant dense<0.000000e+00> : vector<8x128xf32>
    %107 = tpu.matmul %88, %92, %cst_75 {dimension_numbers = #tpu.dot_dimension_numbers<[1], [0], [0], [1], [0, 0, 1, 1], [], []>} : vector<8x128xf32>, vector<128x128xf32>, vector<8x128xf32> -> vector<8x128xf32>
    %108 = arith.addf %106, %107 : vector<8x128xf32>
    %109 = tpu.iota {dimensions = array<i32: 0>} : vector<8x128xi32>
    %c7_i32_76 = arith.constant 7 : i32
    %110 = vector.broadcast %c7_i32_76 : i32 to vector<8x128xi32>
    %111 = arith.cmpi eq, %109, %110 : vector<8x128xi32>
    %c7_i32_77 = arith.constant 7 : i32
    %112 = tpu.dynamic_rotate %81 by %c7_i32_77 dim 0 : vector<8x128xf32>, i32 -> vector<8x128xf32>
    %cst_78 = arith.constant 0.000000e+00 : f32
    %113 = vector.broadcast %cst_78 : f32 to vector<8x128xf32>
    %114 = arith.select %111, %113, %112 : vector<8x128xi1>, vector<8x128xf32>
    %cst_79 = arith.constant dense<0.000000e+00> : vector<8x128xf32>
    %115 = tpu.matmul %114, %94, %cst_79 {dimension_numbers = #tpu.dot_dimension_numbers<[1], [0], [0], [1], [0, 0, 1, 1], [], []>} : vector<8x128xf32>, vector<128x128xf32>, vector<8x128xf32> -> vector<8x128xf32>
    %116 = arith.addf %108, %115 : vector<8x128xf32>
    %c0_80 = arith.constant 0 : index
    %c0_81 = arith.constant 0 : index
    %117 = vector.load %arg10[%c0_80, %c0_81] : memref<1x128xf32, #tpu.memory_space<vmem>>, vector<1x128xf32>
    %c0_82 = arith.constant 0 : index
    %c0_83 = arith.constant 0 : index
    %118 = vector.load %arg11[%c0_82, %c0_83] : memref<1x128xf32, #tpu.memory_space<vmem>>, vector<1x128xf32>
    %119 = vector.broadcast %117 : vector<1x128xf32> to vector<8x128xf32>
    %120 = arith.mulf %105, %119 : vector<8x128xf32>
    %121 = vector.broadcast %118 : vector<1x128xf32> to vector<8x128xf32>
    %122 = arith.addf %120, %121 : vector<8x128xf32>
    %cst_84 = arith.constant 0.000000e+00 : f32
    %123 = vector.broadcast %cst_84 : f32 to vector<8x128xf32>
    %124 = arith.maximumf %122, %123 : vector<8x128xf32>
    %c0_85 = arith.constant 0 : index
    %c0_86 = arith.constant 0 : index
    %c0_87 = arith.constant 0 : index
    %125 = vector.load %arg12[%c0_85, %c0_86, %c0_87] : memref<1x8x256xf32, #tpu.memory_space<vmem>>, vector<1x8x128xf32>
    %126 = vector.shape_cast %125 : vector<1x8x128xf32> to vector<8x128xf32>
    %127 = vector.shape_cast %124 : vector<8x128xf32> to vector<1x8x128xf32>
    tpu.vector_store %arg12[%c0_85, %c0_86, %c0_87], %127 {strides = array<i32>} : memref<1x8x256xf32, #tpu.memory_space<vmem>>, vector<1x8x128xf32>,
    %128 = vector.broadcast %117 : vector<1x128xf32> to vector<8x128xf32>
    %129 = arith.mulf %116, %128 : vector<8x128xf32>
    %130 = vector.broadcast %118 : vector<1x128xf32> to vector<8x128xf32>
    %131 = arith.addf %129, %130 : vector<8x128xf32>
    %cst_88 = arith.constant 0.000000e+00 : f32
    %132 = vector.broadcast %cst_88 : f32 to vector<8x128xf32>
    %133 = arith.maximumf %131, %132 : vector<8x128xf32>
    %c0_89 = arith.constant 0 : index
    %c0_90 = arith.constant 0 : index
    %c128_91 = arith.constant 128 : index
    %134 = vector.load %arg12[%c0_89, %c0_90, %c128_91] : memref<1x8x256xf32, #tpu.memory_space<vmem>>, vector<1x8x128xf32>
    %135 = vector.shape_cast %134 : vector<1x8x128xf32> to vector<8x128xf32>
    %136 = vector.shape_cast %133 : vector<8x128xf32> to vector<1x8x128xf32>
    tpu.vector_store %arg12[%c0_89, %c0_90, %c128_91], %136 {strides = array<i32>} : memref<1x8x256xf32, #tpu.memory_space<vmem>>, vector<1x8x128xf32>,
    return
  }
  func.func @transform_0(%arg0: i32) -> (i32, i32, i32) {
    %c0_i32 = arith.constant 0 : i32
    %c0_i32_0 = arith.constant 0 : i32
    %c0_i32_1 = arith.constant 0 : i32
    return %arg0, %c0_i32, %c0_i32_0 : i32, i32, i32
  }
  func.func @transform_1(%arg0: i32) -> (i32, i32, i32) {
    %c0_i32 = arith.constant 0 : i32
    %c0_i32_0 = arith.constant 0 : i32
    %c0_i32_1 = arith.constant 0 : i32
    return %arg0, %c0_i32, %c0_i32_0 : i32, i32, i32
  }
  func.func @transform_2(%arg0: i32) -> (i32, i32, i32) {
    %c0_i32 = arith.constant 0 : i32
    %c0_i32_0 = arith.constant 0 : i32
    %c0_i32_1 = arith.constant 0 : i32
    %c0_i32_2 = arith.constant 0 : i32
    return %c0_i32, %c0_i32_0, %c0_i32_1 : i32, i32, i32
  }
  func.func @transform_3(%arg0: i32) -> (i32, i32) {
    %c0_i32 = arith.constant 0 : i32
    %c0_i32_0 = arith.constant 0 : i32
    %c0_i32_1 = arith.constant 0 : i32
    return %c0_i32, %c0_i32_0 : i32, i32
  }
  func.func @transform_4(%arg0: i32) -> (i32, i32, i32) {
    %c0_i32 = arith.constant 0 : i32
    %c0_i32_0 = arith.constant 0 : i32
    %c0_i32_1 = arith.constant 0 : i32
    %c0_i32_2 = arith.constant 0 : i32
    return %c0_i32, %c0_i32_0, %c0_i32_1 : i32, i32, i32
  }
  func.func @transform_5(%arg0: i32) -> (i32, i32, i32) {
    %c0_i32 = arith.constant 0 : i32
    %c0_i32_0 = arith.constant 0 : i32
    %c0_i32_1 = arith.constant 0 : i32
    %c0_i32_2 = arith.constant 0 : i32
    return %c0_i32, %c0_i32_0, %c0_i32_1 : i32, i32, i32
  }
  func.func @transform_6(%arg0: i32) -> (i32, i32) {
    %c0_i32 = arith.constant 0 : i32
    %c0_i32_0 = arith.constant 0 : i32
    %c0_i32_1 = arith.constant 0 : i32
    return %c0_i32, %c0_i32_0 : i32, i32
  }
  func.func @transform_7(%arg0: i32) -> (i32, i32) {
    %c0_i32 = arith.constant 0 : i32
    %c0_i32_0 = arith.constant 0 : i32
    %c0_i32_1 = arith.constant 0 : i32
    return %c0_i32, %c0_i32_0 : i32, i32
  }
  func.func @transform_8(%arg0: i32) -> (i32, i32, i32) {
    %c0_i32 = arith.constant 0 : i32
    %c0_i32_0 = arith.constant 0 : i32
    %c0_i32_1 = arith.constant 0 : i32
    %c0_i32_2 = arith.constant 0 : i32
    return %c0_i32, %c0_i32_0, %c0_i32_1 : i32, i32, i32
  }
  func.func @transform_9(%arg0: i32) -> (i32, i32) {
    %c0_i32 = arith.constant 0 : i32
    %c0_i32_0 = arith.constant 0 : i32
    %c0_i32_1 = arith.constant 0 : i32
    return %c0_i32, %c0_i32_0 : i32, i32
  }
  func.func @transform_10(%arg0: i32) -> (i32, i32) {
    %c0_i32 = arith.constant 0 : i32
    %c0_i32_0 = arith.constant 0 : i32
    %c0_i32_1 = arith.constant 0 : i32
    return %c0_i32, %c0_i32_0 : i32, i32
  }
  func.func @transform_11(%arg0: i32) -> (i32, i32, i32) {
    %c0_i32 = arith.constant 0 : i32
    %c0_i32_0 = arith.constant 0 : i32
    %c0_i32_1 = arith.constant 0 : i32
    return %arg0, %c0_i32, %c0_i32_0 : i32, i32, i32
  }
}

</mosaic_0001>

<bundles_post_ra>
// kernel: tile.28
= control target key start
LH: loop header
LB: loop body
LE: loop exit
PB: predicated region body
PF: predicated region fallthrough
CT: control target
= control target key end

     0   :  { %s28_s0 = inlined_call_operand.vmem [shape: f32[8], index: 0, kind: input, shape index: {}]   ;;  %s29_s1 = inlined_call_operand.vmem [shape: f32[16,8], index: 1, kind: output, shape index: {}]  }
   0x1   :  { %v4_v0 = vld [vmem:[%s28_s0] ss:$0 sm:$0xff] }
   0x2   :  { %5 = vst [vmem:[%s29_s1] sm:$0xff] %v4_v0 }
   0x3   :  { %8 = vst [vmem:[%s29_s1 + $0x8] sm:$0xff] %v4_v0 }

// kernel: tile.29
= control target key start
LH: loop header
LB: loop body
LE: loop exit
PB: predicated region body
PF: predicated region fallthrough
CT: control target
= control target key end

     0   :  { %s131_s10 = smov 120   ;;  %s132_s11 = smov 104   ;;  %vm3_vm0 = vcmask 64512   ;;  %vm9_vm1 = vcmask 1048512   ;;  %vm15_vm2 = vcmask 982912   ;;  %vm21_vm3 = vcmask 917312   ;;  %s207_s0 = inlined_call_operand.vmem [shape: f32[16,8], index: 0, kind: input, shape index: {}]   ;;  %s208_s1 = inlined_call_operand.vmem [shape: f32[1,128], index: 1, kind: output, shape index: {}]  }
   0x1   :  { %v101_v0 = vld [vmem:[%s207_s0 + $0xf] sm:$0x1]   ;;  %v103_v1 = vld [vmem:[%s207_s0 + $0xd] sm:$0x1]   ;;  %v105_v2 = vld [vmem:[%s207_s0 + $0xb] sm:$0x1]  }
   0x2   :  { %7 = vrot.lane.b32.xlu0 %v101_v0, %s131_s10  ;;  %19 = vrot.lane.b32.xlu1 %v103_v1, %s132_s11  ;;  %s133_s14 = smov 88   ;;  %v102_v3 = vld [vmem:[%s207_s0 + $0xe] sm:$0x1]   ;;  %v104_v4 = vld [vmem:[%s207_s0 + $0xc] sm:$0x1]   ;;  %s134_s19 = smov 112  }
   0x3   :  { %31 = vrot.lane.b32.xlu2 %v105_v2, %s133_s14  ;;  %s135_s20 = smov 96   ;;  %v106_v5 = vld [vmem:[%s207_s0 + $0xa] sm:$0x1]   ;;  %s136_s23 = smov 80   ;;  %v107_v6 = vld [vmem:[%s207_s0 + $0x9] sm:$0x1]  }
   0x4   :  { %v108_v7 = vld [vmem:[%s207_s0 + $0x8] sm:$0x1]   ;;  %s137_s28 = smov 72   ;;  %s138_s29 = smov 64   ;;  %v109_v8 = vld [vmem:[%s207_s0 + $0x7] sm:$0x1]  }
   0x5   :  { %s139_s3 = smov 56   ;;  %v110_v9 = vld [vmem:[%s207_s0 + $0x6] sm:$0x1]   ;;  %v111_v10 = vld [vmem:[%s207_s0 + $0x5] sm:$0x1]   ;;  %s140_s8 = smov 48  }
   0x6   :  { %s141_s9 = smov 40   ;;  %v112_v11 = vld [vmem:[%s207_s0 + $0x4] sm:$0x1]   ;;  %s142_s12 = smov 32   ;;  %v113_v12 = vld [vmem:[%s207_s0 + $0x3] sm:$0x1]  }
   0x7   :  { %v114_v13 = vld [vmem:[%s207_s0 + $0x2] sm:$0x1]   ;;  %s143_s17 = smov 24   ;;  %s144_s18 = smov 16   ;;  %v115_v14 = vld [vmem:[%s207_s0 + $0x1] sm:$0x1]  }
   0x8   :  { %s145_s21 = smov 8   ;;  %v2_v15 = vld [vmem:[%s207_s0] sm:$0x1]   ;;  %vm27_vm4 = vcmask 851712   ;;  %vm33_vm5 = vcmask 786112   ;;  %vm39_vm6 = vcmask 720512  }
   0x9   :  { %4 = vst.msk [vmem:[#allocation0] sm:$0x1] %vm3_vm0, %v2_v15   ;;  %vm45_vm7 = vcmask 654912   ;;  %vm51_vm8 = vcmask 589312   ;;  %vm57_vm9 = vcmask 523712   ;;  %vm63_vm10 = vcmask 458112  }
   0xa   :  { %13 = vrot.lane.b32.xlu0 %v102_v3, %s134_s19  ;;  %25 = vrot.lane.b32.xlu1 %v104_v4, %s135_s20  ;;  %vm69_vm11 = vcmask 392512   ;;  %vm75_vm12 = vcmask 326912   ;;  %vm81_vm13 = vcmask 261312   ;;  %vm87_vm14 = vcmask 195712  }
   0xb   :  { %37 = vrot.lane.b32.xlu2 %v106_v5, %s136_s23  ;;  %vm93_vm15 = vcmask 130112  }
  0x12   :  { %43 = vrot.lane.b32.xlu0 %v107_v6, %s137_s28  ;;  %49 = vrot.lane.b32.xlu1 %v108_v7, %s138_s29 }
  0x13   :  { %55 = vrot.lane.b32.xlu2 %v109_v8, %s139_s3 }
  0x1a   :  { %61 = vrot.lane.b32.xlu0 %v110_v9, %s140_s8  ;;  %67 = vrot.lane.b32.xlu1 %v111_v10, %s141_s9 }
  0x1b   :  { %73 = vrot.lane.b32.xlu2 %v112_v11, %s142_s12 }
  0x22   :  { %79 = vrot.lane.b32.xlu0 %v113_v12, %s143_s17  ;;  %85 = vrot.lane.b32.xlu1 %v114_v13, %s144_s18 }
  0x23   :  { %91 = vrot.lane.b32.xlu2 %v115_v14, %s145_s21 }
  0x5d   :  { %v32_v16 = vpop.permute.xlu2 %31  }
  0x65   :  { %v38_v17 = vpop.permute.xlu2 %37  }
  0x6d   :  { %v56_v18 = vpop.permute.xlu2 %55  }
  0x74   :  { %v8_v19 = vpop.permute.xlu0 %7   ;;  %v20_v20 = vpop.permute.xlu1 %19  }
  0x75   :  { %10 = vst.msk [vmem:[#allocation0] sm:$0x1] %vm9_vm1, %v8_v19   ;;  %v74_v21 = vpop.permute.xlu2 %73  }
  0x7c   :  { %v14_v22 = vpop.permute.xlu0 %13   ;;  %v26_v23 = vpop.permute.xlu1 %25  }
  0x7d   :  { %16 = vst.msk [vmem:[#allocation0] sm:$0x1] %vm15_vm2, %v14_v22   ;;  %v92_v24 = vpop.permute.xlu2 %91  }
  0x7e   :  { %22 = vst.msk [vmem:[#allocation0] sm:$0x1] %vm21_vm3, %v20_v20  }
  0x7f   :  { %28 = vst.msk [vmem:[#allocation0] sm:$0x1] %vm27_vm4, %v26_v23  }
  0x80   :  { %34 = vst.msk [vmem:[#allocation0] sm:$0x1] %vm33_vm5, %v32_v16  }
  0x81   :  { %40 = vst.msk [vmem:[#allocation0] sm:$0x1] %vm39_vm6, %v38_v17  }
  0x84   :  { %v44_v25 = vpop.permute.xlu0 %43   ;;  %v50_v26 = vpop.permute.xlu1 %49  }
  0x85   :  { %46 = vst.msk [vmem:[#allocation0] sm:$0x1] %vm45_vm7, %v44_v25  }
  0x86   :  { %52 = vst.msk [vmem:[#allocation0] sm:$0x1] %vm51_vm8, %v50_v26  }
  0x87   :  { %58 = vst.msk [vmem:[#allocation0] sm:$0x1] %vm57_vm9, %v56_v18  }
  0x8c   :  { %v62_v27 = vpop.permute.xlu0 %61   ;;  %v68_v28 = vpop.permute.xlu1 %67  }
  0x8d   :  { %64 = vst.msk [vmem:[#allocation0] sm:$0x1] %vm63_vm10, %v62_v27  }
  0x8e   :  { %70 = vst.msk [vmem:[#allocation0] sm:$0x1] %vm69_vm11, %v68_v28  }
  0x8f   :  { %76 = vst.msk [vmem:[#allocation0] sm:$0x1] %vm75_vm12, %v74_v21  }
  0x94   :  { %v80_v29 = vpop.permute.xlu0 %79   ;;  %v86_v30 = vpop.permute.xlu1 %85  }
  0x95   :  { %82 = vst.msk [vmem:[#allocation0] sm:$0x1] %vm81_vm13, %v80_v29  }
  0x96   :  { %88 = vst.msk [vmem:[#allocation0] sm:$0x1] %vm87_vm14, %v86_v30  }
  0x97   :  { %94 = vst.msk [vmem:[#allocation0] sm:$0x1] %vm93_vm15, %v92_v24  }
  0x9e   :  { %v97_v31 = vld [vmem:[#allocation0] sm:$0x1] }
  0x9f   :  { %100 = vst [vmem:[%s208_s1] sm:$0x1] %v97_v31 }

// kernel: up_forward.1
= control target key start
LH: loop header
LB: loop body
LE: loop exit
PB: predicated region body
PF: predicated region fallthrough
CT: control target
= control target key end

     0   :  { %s1318_s17 = smov 0   ;;  %s2138_s0 = inlined_call_operand.vmem [shape: f32[2,8,64], index: 0, kind: input, shape index: {}]   ;;  %s2139_s1 = inlined_call_operand.vmem [shape: f32[2,8,256], index: 1, kind: input, shape index: {}]   ;;  %s2140_s2 = inlined_call_operand.vmem [shape: f32[2,64,128], index: 2, kind: input, shape index: {}]   ;;  %s2141_s3 = inlined_call_operand.vmem [shape: f32[1,128], index: 3, kind: input, shape index: {}]   ;;  %s2142_s4 = inlined_call_operand.vmem [shape: f32[3,128,128], index: 4, kind: input, shape index: {}]   ;;  %s2143_s5 = inlined_call_operand.vmem [shape: f32[3,128,128], index: 5, kind: input, shape index: {}]   ;;  %s2144_s6 = inlined_call_operand.vmem [shape: f32[1,128], index: 6, kind: input, shape index: {}]   ;;  %s2145_s7 = inlined_call_operand.vmem [shape: f32[1,128], index: 7, kind: input, shape index: {}]   ;;  %s2146_s8 = inlined_call_operand.vmem [shape: f32[3,128,128], index: 8, kind: input, shape index: {}]   ;;  %s2147_s9 = inlined_call_operand.vmem [shape: f32[1,128], index: 9, kind: input, shape index: {}]   ;;  %s2148_s10 = inlined_call_operand.vmem [shape: f32[1,128], index: 10, kind: input, shape index: {}]   ;;  %s2149_s11 = inlined_call_operand.vmem [shape: f32[2,8,256], index: 11, kind: output, shape index: {}]  }
   0x1 LB: > { %s1103_s18 = sadd.s32 4294967295, %s1256_s17   ;;  %p1107_p0 = scmp.ge.s32.totalorder %s1256_s17, 1  ;;  %s1256_s17 = sphi %s1318_s17, %s21_s17  }
   0x2   : > { %p346_p1 = scmp.lt.s32.totalorder %s1256_s17, 3 }
   0x4   : > { %p347_p2 = pnand %p1107_p0, %p346_p1 }
   0x5   : > { %p390_p3 = scmp.lt.s32.totalorder (!%p347_p2), %s1103_s18, 1 }
   0x6   : > { %350 = sbr.rel (%p347_p2) target bundleno = 453 (0x1c5), region = 64 }
   0xb   : > { %v415_v0 = vld [vmem:[%s2140_s2 + $0x38] sm:$0xff]  ;;  %v414_v2 = vld [vmem:[%s2140_s2 + $0x30] sm:$0xff]  ;;  %v413_v4 = vld [vmem:[%s2140_s2 + $0x28] sm:$0xff]  ;;  %s2151_s18 = smov (!%p390_p3, %s1103_s18), 1  ;;  %vm419_vm0 = vcmask 523264  }
   0xc   : > { %v1121_v1 = vld [vmem:[%s2140_s2 + $0x78] sm:$0xff]  ;;  %431 = vmatpush.msra.mxu0 %v415_v0  ;;  %v1120_v3 = vld [vmem:[%s2140_s2 + $0x70] sm:$0xff]  ;;  %v1119_v5 = vld [vmem:[%s2140_s2 + $0x68] sm:$0xff]  ;;  %s1108_s30 = sshll.u32 %s2151_s18, 3  ;;  %s1233_s23 = sshll.u32 %s2151_s18, 4 }
   0xd   : > { %460 = vmatpush.msra.mxu1 %v1121_v1  ;;  %v412_v6 = vld [vmem:[%s2140_s2 + $0x20] sm:$0xff]  ;;  %v411_v8 = vld [vmem:[%s2140_s2 + $0x18] sm:$0xff]  ;;  %v1137_v12 = vld [vmem:[%s2142_s4 + $0xf0] sm:$0xff]  ;;  %s393_s14 = scalar_lea.vmem %s2138_s0, %s1108_s30  ;;  %s398_s13 = scalar_lea.vmem %s2139_s1, %s1233_s23 }
   0xe   : > { %432 = vmatpush.msra.mxu0 %v414_v2  ;;  %v1118_v7 = vld [vmem:[%s2140_s2 + $0x60] sm:$0xff]  ;;  %v1138_v9 = vld [vmem:[%s2142_s4 + $0xf8] sm:$0xff]  ;;  %v1373_v13 = vld [vmem:[%s2142_s4 + $0x70] sm:$0xff]  ;;  %s403_s12 = scalar_lea.vmem %s2149_s11, %s1233_s23 }
   0xf   : > { %461 = vmatpush.msra.mxu1 %v1120_v3  ;;  %v1361_v10 = vld [vmem:[%s2142_s4 + $0x78] sm:$0xff]  ;;  %527 = vmatpush.msra.mxu2 %v1138_v9  ;;  %v1136_v14 = vld [vmem:[%s2142_s4 + $0xe8] sm:$0xff]  ;;  %v410_v16 = vld [vmem:[%s2140_s2 + $0x10] sm:$0xff] }
  0x10   : > { %433 = vmatpush.msra.mxu0 %v413_v4  ;;  %v1117_v11 = vld [vmem:[%s2140_s2 + $0x58] sm:$0xff]  ;;  %547 = vmatpush.msra.mxu3 %v1361_v10  ;;  %v1382_v15 = vld [vmem:[%s2142_s4 + $0x68] sm:$0xff]  ;;  %v1116_v17 = vld [vmem:[%s2140_s2 + $0x50] sm:$0xff] }
  0x11   : > { %462 = vmatpush.msra.mxu1 %v1119_v5  ;;  %528 = vmatpush.msra.mxu2 %v1137_v12  ;;  %v1135_v18 = vld [vmem:[%s2142_s4 + $0xe0] sm:$0xff]  ;;  %v409_v20 = vld [vmem:[%s2140_s2 + $0x8] sm:$0xff]  ;;  %v1134_v22 = vld [vmem:[%s2142_s4 + $0xd8] sm:$0xff] }
  0x12   : > { %434 = vmatpush.msra.mxu0 %v412_v6  ;;  %548 = vmatpush.msra.mxu3 %v1373_v13  ;;  %v1397_v19 = vld [vmem:[%s2142_s4 + $0x60] sm:$0xff]  ;;  %v1115_v21 = vld [vmem:[%s2140_s2 + $0x48] sm:$0xff]  ;;  %v1415_v23 = vld [vmem:[%s2142_s4 + $0x58] sm:$0xff] }
  0x13   : > { %463 = vmatpush.msra.mxu1 %v1118_v7  ;;  %529 = vmatpush.msra.mxu2 %v1136_v14  ;;  %v408_v24 = vld [vmem:[%s2140_s2] sm:$0xff]  ;;  %v1428_v27 = vld [vmem:[%s2142_s4 + $0x178] sm:$0xff]  ;;  %v1133_v28 = vld [vmem:[%s2142_s4 + $0xd0] sm:$0xff] }
  0x14   : > { %435 = vmatpush.msra.mxu0 %v411_v8  ;;  %549 = vmatpush.msra.mxu3 %v1382_v15  ;;  %v1114_v25 = vld [vmem:[%s2140_s2 + $0x40] sm:$0xff]  ;;  %v1436_v29 = vld [vmem:[%s2142_s4 + $0x50] sm:$0xff]  ;;  %v1132_v31 = vld [vmem:[%s2142_s4 + $0xc8] sm:$0xff] }
  0x15   : > { %464 = vmatpush.msra.mxu1 %v1117_v11  ;;  %530 = vmatpush.msra.mxu2 %v1135_v18  ;;  %v404_v26 = vld [vmem:[%s393_s14] sm:$0xff]  ;;  %v1441_v30 = vld [vmem:[%s2142_s4 + $0x170] sm:$0xff]  ;;  %v1450_v32 = vld [vmem:[%s2142_s4 + $0x48] sm:$0xff] }
  0x16   : > { %436 = vmatpush.msra.mxu0 %v410_v16  ;;  %550 = vmatpush.msra.mxu3 %v1397_v19  ;;  %v1456_v33 = vld [vmem:[%s2142_s4 + $0x168] sm:$0xff]  ;;  %v1131_v34 = vld [vmem:[%s2142_s4 + $0xc0] sm:$0xff]  ;;  %v1130_v37 = vld [vmem:[%s2142_s4 + $0xb8] sm:$0xff] }
  0x17   : > { %465 = vmatpush.msra.mxu1 %v1116_v17  ;;  %531 = vmatpush.msra.mxu2 %v1134_v22  ;;  %v1465_v35 = vld [vmem:[%s2142_s4 + $0x40] sm:$0xff]  ;;  %v1480_v38 = vld [vmem:[%s2142_s4 + $0x38] sm:$0xff]  ;;  %v1129_v40 = vld [vmem:[%s2142_s4 + $0xb0] sm:$0xff] }
  0x18   : > { %437 = vmatpush.msra.mxu0 %v409_v20  ;;  %551 = vmatpush.msra.mxu3 %v1415_v23  ;;  %v1471_v36 = vld [vmem:[%s2142_s4 + $0x160] sm:$0xff]  ;;  %v1486_v39 = vld [vmem:[%s2142_s4 + $0x158] sm:$0xff]  ;;  %v1495_v41 = vld [vmem:[%s2142_s4 + $0x30] sm:$0xff] }
  0x19   : > { %466 = vmatpush.msra.mxu1 %v1115_v21  ;;  %532 = vmatpush.msra.mxu2 %v1133_v28  ;;  %v1500_v42 = vld [vmem:[%s2142_s4 + $0x150] sm:$0xff]  ;;  %v1128_v43 = vld [vmem:[%s2142_s4 + $0xa8] sm:$0xff]  ;;  %v1127_v46 = vld [vmem:[%s2142_s4 + $0xa0] sm:$0xff] }
  0x1a   : > { %438 = vmatpush.msra.mxu0 %v408_v24  ;;  %552 = vmatpush.msra.mxu3 %v1436_v29  ;;  %v1509_v44 = vld [vmem:[%s2142_s4 + $0x28] sm:$0xff]  ;;  %v1525_v47 = vld [vmem:[%s2142_s4 + $0x20] sm:$0xff]  ;;  %v1126_v49 = vld [vmem:[%s2142_s4 + $0x98] sm:$0xff] }
  0x1b   : > { %467 = vmatpush.msra.mxu1 %v1114_v25  ;;  %1113 = vmatmul.msk.f32.vlgmr.msra.gmra.mxu0 %vm419_vm0, %v404_v26  ;;  %v1516_v45 = vld [vmem:[%s2142_s4 + $0x148] sm:$0xff]  ;;  %v1531_v48 = vld [vmem:[%s2142_s4 + $0x140] sm:$0xff]  ;;  %v1540_v50 = vld [vmem:[%s2142_s4 + $0x18] sm:$0xff] }
  0x1c   : > { %1122 = vmatmul.msk.f32.vlgmr.msra.gmra.mxu1 %vm419_vm0, %v404_v26  ;;  %567 = vmatpush.msrb.mxu0 %v1428_v27  ;;  %v1546_v51 = vld [vmem:[%s2142_s4 + $0x138] sm:$0xff]  ;;  %v1125_v52 = vld [vmem:[%s2142_s4 + $0x90] sm:$0xff]  ;;  %v1124_v55 = vld [vmem:[%s2142_s4 + $0x88] sm:$0xff] }
  0x1d   : > { %588 = vmatpush.msrb.mxu1 %v1138_v9  ;;  %533 = vmatpush.msra.mxu2 %v1132_v31  ;;  %v1555_v53 = vld [vmem:[%s2142_s4 + $0x10] sm:$0xff]  ;;  %v1570_v56 = vld [vmem:[%s2142_s4 + $0x8] sm:$0xff]  ;;  %v1123_v58 = vld [vmem:[%s2142_s4 + $0x80] sm:$0xff] }
  0x1e   : > { %568 = vmatpush.msrb.mxu0 %v1441_v30  ;;  %553 = vmatpush.msra.mxu3 %v1450_v32  ;;  %v1561_v54 = vld [vmem:[%s2142_s4 + $0x130] sm:$0xff]  ;;  %v1576_v57 = vld [vmem:[%s2142_s4 + $0x128] sm:$0xff]  ;;  %v1585_v59 = vld [vmem:[%s2142_s4] sm:$0xff] }
  0x1f   : > { %589 = vmatpush.msrb.mxu1 %v1137_v12  ;;  %534 = vmatpush.msra.mxu2 %v1131_v34  ;;  %v1591_v60 = vld [vmem:[%s2142_s4 + $0x120] sm:$0xff]  ;;  %v1598_v61 = vld [vmem:[%s2142_s4 + $0x118] sm:$0xff]  ;;  %v1606_v62 = vld [vmem:[%s2142_s4 + $0x110] sm:$0xff] }
  0x20   : > { %569 = vmatpush.msrb.mxu0 %v1456_v33  ;;  %554 = vmatpush.msra.mxu3 %v1465_v35  ;;  %v1614_v63 = vld [vmem:[%s2142_s4 + $0x108] sm:$0xff]  ;;  %v1622_v0 = vld [vmem:[%s2142_s4 + $0x100] sm:$0xff]  ;;  %v1629_v1 = vld [vmem:[%s2143_s5 + $0xf8] sm:$0xff] }
  0x21   : > { %590 = vmatpush.msrb.mxu1 %v1136_v14  ;;  %535 = vmatpush.msra.mxu2 %v1130_v37  ;;  %v1637_v2 = vld [vmem:[%s2143_s5 + $0xf0] sm:$0xff]  ;;  %v1644_v3 = vld [vmem:[%s2143_s5 + $0x78] sm:$0xff]  ;;  %v1650_v4 = vld [vmem:[%s2143_s5 + $0xe8] sm:$0xff] }
  0x22   : > { %570 = vmatpush.msrb.mxu0 %v1471_v36  ;;  %555 = vmatpush.msra.mxu3 %v1480_v38  ;;  %v1657_v5 = vld [vmem:[%s2143_s5 + $0x70] sm:$0xff]  ;;  %v1664_v6 = vld [vmem:[%s2143_s5 + $0xe0] sm:$0xff]  ;;  %v1671_v7 = vld [vmem:[%s2143_s5 + $0x68] sm:$0xff] }
  0x23   : > { %591 = vmatpush.msrb.mxu1 %v1135_v18  ;;  %536 = vmatpush.msra.mxu2 %v1129_v40  ;;  %v1678_v8 = vld [vmem:[%s2143_s5 + $0xd8] sm:$0xff]  ;;  %v1685_v9 = vld [vmem:[%s2143_s5 + $0x60] sm:$0xff]  ;;  %v1706_v12 = vld [vmem:[%s2143_s5 + $0xc8] sm:$0xff] }
  0x24   : > { %571 = vmatpush.msrb.mxu0 %v1486_v39  ;;  %556 = vmatpush.msra.mxu3 %v1495_v41  ;;  %v1699_v11 = vld [vmem:[%s2143_s5 + $0x58] sm:$0xff]  ;;  %v1721_v14 = vld [vmem:[%s2143_s5 + $0xc0] sm:$0xff]  ;;  %v1728_v16 = vld [vmem:[%s2143_s5 + $0x48] sm:$0xff] }
  0x25   : > { %592 = vmatpush.msrb.mxu1 %v1134_v22  ;;  %537 = vmatpush.msra.mxu2 %v1128_v43  ;;  %v1740_v17 = vld [vmem:[%s2143_s5 + $0xb8] sm:$0xff]  ;;  %v1747_v18 = vld [vmem:[%s2143_s5 + $0x40] sm:$0xff]  ;;  %v1756_v20 = vld [vmem:[%s398_s13 + $0x8] sm:$0xff] }
  0x26   : > { %572 = vmatpush.msrb.mxu0 %v1500_v42  ;;  %557 = vmatpush.msra.mxu3 %v1509_v44  ;;  %v1765_v22 = vld [vmem:[%s2143_s5 + $0x38] sm:$0xff]  ;;  %v1774_v24 = vld [vmem:[%s2143_s5 + $0xa8] sm:$0xff]  ;;  %v1779_v25 = vld [vmem:[%s2143_s5 + $0x30] sm:$0xff]  ;;  %v525_v26 = vrot.slane %v1756_v20, 7 }
  0x27   : > { %593 = vmatpush.msrb.mxu1 %v1133_v28  ;;  %538 = vmatpush.msra.mxu2 %v1127_v46  ;;  %v1796_v28 = vld [vmem:[%s2143_s5 + $0x28] sm:$0xff] }
  0x28   : > { %573 = vmatpush.msrb.mxu0 %v1516_v45  ;;  %558 = vmatpush.msra.mxu3 %v1525_v47 }
  0x29   : > { %594 = vmatpush.msrb.mxu1 %v1132_v31  ;;  %539 = vmatpush.msra.mxu2 %v1126_v49  ;;  %v1814_v31 = vld [vmem:[%s2143_s5 + $0x20] sm:$0xff] }
  0x2a   : > { %574 = vmatpush.msrb.mxu0 %v1531_v48  ;;  %559 = vmatpush.msra.mxu3 %v1540_v50 }
  0x2b   : > { %595 = vmatpush.msrb.mxu1 %v1131_v34  ;;  %540 = vmatpush.msra.mxu2 %v1125_v52  ;;  %v1830_v34 = vld [vmem:[%s2143_s5 + $0x18] sm:$0xff] }
  0x2c   : > { %575 = vmatpush.msrb.mxu0 %v1546_v51  ;;  %560 = vmatpush.msra.mxu3 %v1555_v53 }
  0x2d   : > { %596 = vmatpush.msrb.mxu1 %v1130_v37  ;;  %541 = vmatpush.msra.mxu2 %v1124_v55  ;;  %v1841_v37 = vld [vmem:[%s2143_s5 + $0x88] sm:$0xff] }
  0x2e   : > { %576 = vmatpush.msrb.mxu0 %v1561_v54  ;;  %561 = vmatpush.msra.mxu3 %v1570_v56 }
  0x2f   : > { %597 = vmatpush.msrb.mxu1 %v1129_v40  ;;  %542 = vmatpush.msra.mxu2 %v1123_v58  ;;  %v1857_v40 = vld [vmem:[%s2143_s5 + $0x80] sm:$0xff] }
  0x30   : > { %577 = vmatpush.msrb.mxu0 %v1576_v57  ;;  %562 = vmatpush.msra.mxu3 %v1585_v59 }
  0x31   : > { %598 = vmatpush.msrb.mxu1 %v1128_v43  ;;  %608 = vmatpush.msrb.mxu2 %v1361_v10  ;;  %v1692_v10 = vld [vmem:[%s2143_s5 + $0xd0] sm:$0xff]  ;;  %v1876_v43 = vld [vmem:[%s2143_s5] sm:$0xff] }
  0x32   : > { %578 = vmatpush.msrb.mxu0 %v1591_v60  ;;  %631 = vmatpush.msrb.mxu3 %v1428_v27  ;;  %v1789_v27 = vld [vmem:[%s2143_s5 + $0xa0] sm:$0xff] }
  0x33   : > { %599 = vmatpush.msrb.mxu1 %v1127_v46  ;;  %609 = vmatpush.msrb.mxu2 %v1373_v13  ;;  %v1714_v13 = vld [vmem:[%s2143_s5 + $0x50] sm:$0xff]  ;;  %v1183_v46 = vld [vmem:[%s2143_s5 + $0x140] sm:$0xff] }
  0x34   : > { %579 = vmatpush.msrb.mxu0 %v1598_v61  ;;  %632 = vmatpush.msrb.mxu3 %v1441_v30  ;;  %v1807_v30 = vld [vmem:[%s2143_s5 + $0x98] sm:$0xff] }
  0x35   : > { %600 = vmatpush.msrb.mxu1 %v1126_v49  ;;  %610 = vmatpush.msrb.mxu2 %v1382_v15  ;;  %v522_v15 = vlaneseq  ;;  %v1180_v49 = vld [vmem:[%s2143_s5 + $0x128] sm:$0xff] }
  0x36   : > { %580 = vmatpush.msrb.mxu0 %v1606_v62  ;;  %633 = vmatpush.msrb.mxu3 %v1456_v33  ;;  %v1823_v33 = vld [vmem:[%s2143_s5 + $0x90] sm:$0xff] }
  0x37   : > { %601 = vmatpush.msrb.mxu1 %v1125_v52  ;;  %611 = vmatpush.msrb.mxu2 %v1397_v19  ;;  %v1754_v19 = vld [vmem:[%s2143_s5 + $0xb0] sm:$0xff]  ;;  %v1758_v21 = vshrl.u32 %v522_v15, 7  ;;  %v1200_v15 = vld [vmem:[%s2146_s8 + $0xa8] sm:$0xff] }
  0x38   : > { %581 = vmatpush.msrb.mxu0 %v1614_v63  ;;  %634 = vmatpush.msrb.mxu3 %v1471_v36  ;;  %v1177_v52 = vld [vmem:[%s2143_s5 + $0x110] sm:$0xff] }
  0x39   : > { %602 = vmatpush.msrb.mxu1 %v1124_v55  ;;  %612 = vmatpush.msrb.mxu2 %v1415_v23  ;;  %v405_v23 = vld [vmem:[%s398_s13] sm:$0xff]  ;;  %vm1235_vm1 = vcmp.ne.s32.totalorder %v1758_v21, 0  ;;  %vm1236_vm2 = vcmp.ne.s32.totalorder %v1758_v21, 7  ;;  %v1210_v55 = vld [vmem:[%s2146_s8 + $0xf8] sm:$0xff] }
  0x3a   : > { %582 = vmatpush.msrb.mxu0 %v1622_v0  ;;  %635 = vmatpush.msrb.mxu3 %v1486_v39  ;;  %v629_v36 = vrot.slane %v405_v23, 1  ;;  %v1187_v39 = vld [vmem:[%s2143_s5 + $0x160] sm:$0xff] }
  0x3b   : > { %603 = vmatpush.msrb.mxu1 %v1123_v58  ;;  %613 = vmatpush.msrb.mxu2 %v1436_v29  ;;  %v1190_v29 = vld [vmem:[%s2143_s5 + $0x178] sm:$0xff]  ;;  %v1208_v58 = vld [vmem:[%s2146_s8 + $0xe8] sm:$0xff] }
  0x3c   : > { %704 = vmatpush.msra.mxu0 %v1629_v1  ;;  %636 = vmatpush.msrb.mxu3 %v1500_v42  ;;  %v1186_v42 = vld [vmem:[%s2143_s5 + $0x158] sm:$0xff] }
  0x3d   : > { %724 = vmatpush.msra.mxu1 %v1644_v3  ;;  %614 = vmatpush.msrb.mxu2 %v1450_v32  ;;  %v1189_v32 = vld [vmem:[%s2143_s5 + $0x170] sm:$0xff] }
  0x3e   : > { %705 = vmatpush.msra.mxu0 %v1637_v2  ;;  %637 = vmatpush.msrb.mxu3 %v1516_v45  ;;  %v1184_v45 = vld [vmem:[%s2143_s5 + $0x148] sm:$0xff] }
  0x3f   : > { %725 = vmatpush.msra.mxu1 %v1657_v5  ;;  %615 = vmatpush.msrb.mxu2 %v1465_v35  ;;  %v1188_v35 = vld [vmem:[%s2143_s5 + $0x168] sm:$0xff] }
  0x40   : > { %706 = vmatpush.msra.mxu0 %v1650_v4  ;;  %638 = vmatpush.msrb.mxu3 %v1531_v48  ;;  %v1181_v48 = vld [vmem:[%s2143_s5 + $0x130] sm:$0xff] }
  0x41   : > { %726 = vmatpush.msra.mxu1 %v1671_v7  ;;  %616 = vmatpush.msrb.mxu2 %v1480_v38  ;;  %v1846_v38 = vld [vmem:[%s2143_s5 + $0x10] sm:$0xff] }
  0x42   : > { %707 = vmatpush.msra.mxu0 %v1664_v6  ;;  %639 = vmatpush.msrb.mxu3 %v1546_v51  ;;  %v1178_v51 = vld [vmem:[%s2143_s5 + $0x118] sm:$0xff] }
  0x43   : > { %727 = vmatpush.msra.mxu1 %v1685_v9  ;;  %617 = vmatpush.msrb.mxu2 %v1495_v41  ;;  %v1864_v41 = vld [vmem:[%s2143_s5 + $0x8] sm:$0xff] }
  0x44   : > { %708 = vmatpush.msra.mxu0 %v1678_v8  ;;  %640 = vmatpush.msrb.mxu3 %v1561_v54  ;;  %v1175_v54 = vld [vmem:[%s2143_s5 + $0x100] sm:$0xff] }
  0x45   : > { %728 = vmatpush.msra.mxu1 %v1699_v11  ;;  %618 = vmatpush.msrb.mxu2 %v1509_v44  ;;  %v1185_v44 = vld [vmem:[%s2143_s5 + $0x150] sm:$0xff] }
  0x46   : > { %709 = vmatpush.msra.mxu0 %v1692_v10  ;;  %641 = vmatpush.msrb.mxu3 %v1576_v57  ;;  %v1952_v57 = vld [vmem:[%s2146_s8 + $0x78] sm:$0xff] }
  0x47   : > { %729 = vmatpush.msra.mxu1 %v1714_v13  ;;  %619 = vmatpush.msrb.mxu2 %v1525_v47  ;;  %v1182_v47 = vld [vmem:[%s2143_s5 + $0x138] sm:$0xff] }
  0x48   : > { %710 = vmatpush.msra.mxu0 %v1706_v12  ;;  %642 = vmatpush.msrb.mxu3 %v1591_v60  ;;  %v1245_v60 = vld [vmem:[%s2141_s3] ss:$0 sm:$0xff] }
  0x49   : > { %730 = vmatpush.msra.mxu1 %v1728_v16  ;;  %620 = vmatpush.msrb.mxu2 %v1540_v50  ;;  %v1179_v50 = vld [vmem:[%s2143_s5 + $0x120] sm:$0xff] }
  0x4a   : > { %711 = vmatpush.msra.mxu0 %v1721_v14  ;;  %643 = vmatpush.msrb.mxu3 %v1598_v61 }
  0x4b   : > { %731 = vmatpush.msra.mxu1 %v1747_v18  ;;  %621 = vmatpush.msrb.mxu2 %v1555_v53  ;;  %v1176_v53 = vld [vmem:[%s2143_s5 + $0x108] sm:$0xff] }
  0x4c   : > { %712 = vmatpush.msra.mxu0 %v1740_v17  ;;  %644 = vmatpush.msrb.mxu3 %v1606_v62 }
  0x4d   : > { %732 = vmatpush.msra.mxu1 %v1765_v22  ;;  %543 = vmatmul.f32.vlgmr.msra.gmra.mxu2 %v405_v23 }
  0x4e   : > { %713 = vmatpush.msra.mxu0 %v1754_v19  ;;  %622 = vmatpush.msrb.mxu2 %v1570_v56  ;;  %v1209_v56 = vld [vmem:[%s2146_s8 + $0xf0] sm:$0xff] }
  0x4f   : > { %645 = vmatpush.msrb.mxu3 %v1614_v63  ;;  %733 = vmatpush.msra.mxu1 %v1779_v25 }
  0x50   : > { %714 = vmatpush.msra.mxu0 %v1774_v24  ;;  %1156 = vmatmul.msk.f32.vlgmr.msra.gmra.mxu3 %vm1235_vm1, %v525_v26  ;;  %v849_v26 = vld [vmem:[%s2146_s8 + $0x28] sm:$0xff] }
  0x51   : > { %623 = vmatpush.msrb.mxu2 %v1585_v59  ;;  %646 = vmatpush.msrb.mxu3 %v1622_v0  ;;  %v1207_v59 = vld [vmem:[%s2146_s8 + $0xe0] sm:$0xff] }
  0x52   : > { %715 = vmatpush.msra.mxu0 %v1789_v27  ;;  %734 = vmatpush.msra.mxu1 %v1796_v28 }
  0x53   : > { %744 = vmatpush.msra.mxu2 %v1190_v29  ;;  %765 = vmatpush.msra.mxu3 %v1629_v1 }
  0x54   : > { %716 = vmatpush.msra.mxu0 %v1807_v30  ;;  %735 = vmatpush.msra.mxu1 %v1814_v31 }
  0x55   : > { %745 = vmatpush.msra.mxu2 %v1189_v32  ;;  %766 = vmatpush.msra.mxu3 %v1637_v2 }
  0x56   : > { %717 = vmatpush.msra.mxu0 %v1823_v33  ;;  %736 = vmatpush.msra.mxu1 %v1830_v34 }
  0x57   : > { %624 = vmatmul.f32.vlgmr.msrb.gmra.mxu2 %v405_v23  ;;  %767 = vmatpush.msra.mxu3 %v1650_v4  ;;  %v1974_v4 = vld [vmem:[%s2146_s8 + $0x70] sm:$0xff] }
  0x58   : > { %746 = vmatpush.msra.mxu2 %v1188_v35  ;;  %718 = vmatpush.msra.mxu0 %v1841_v37  ;;  %v1225_v23 = vld [vmem:[%s2146_s8 + $0x170] sm:$0xff] }
  0x59   : > { %737 = vmatpush.msra.mxu1 %v1846_v38  ;;  %1158 = vmatmul.msk.f32.vlgmr.msrb.gmra.mxu3 %vm1236_vm2, %v629_v36  ;;  %v1221_v36 = vld [vmem:[%s2146_s8 + $0x150] sm:$0xff] }
  0x5a   : > { %747 = vmatpush.msra.mxu2 %v1187_v39  ;;  %768 = vmatpush.msra.mxu3 %v1664_v6  ;;  %v1983_v6 = vld [vmem:[%s2146_s8 + $0x68] sm:$0xff] }
  0x5b   : > { %719 = vmatpush.msra.mxu0 %v1857_v40  ;;  %738 = vmatpush.msra.mxu1 %v1864_v41 }
  0x5c   : > { %583 = vmatmul.f32.vlgmr.msrb.gmra.mxu0 %v1756_v20  ;;  %748 = vmatpush.msra.mxu2 %v1186_v42 }
  0x5d   : > { %769 = vmatpush.msra.mxu3 %v1678_v8  ;;  %785 = vmatpush.msrb.mxu0 %v1644_v3  ;;  %v1206_v3 = vld [vmem:[%s2146_s8 + $0xd8] sm:$0xff]  ;;  %v1992_v8 = vld [vmem:[%s2146_s8 + $0x60] sm:$0xff] }
  0x5e   : > { %739 = vmatpush.msra.mxu1 %v1876_v43  ;;  %749 = vmatpush.msra.mxu2 %v1185_v44 }
  0x5f   : > { %604 = vmatmul.f32.vlgmr.msrb.gmra.mxu1 %v1756_v20  ;;  %770 = vmatpush.msra.mxu3 %v1692_v10  ;;  %v2001_v10 = vld [vmem:[%s2146_s8 + $0x58] sm:$0xff] }
  0x60   : > { %786 = vmatpush.msrb.mxu0 %v1657_v5  ;;  %807 = vmatpush.msrb.mxu1 %v1190_v29  ;;  %v1205_v5 = vld [vmem:[%s2146_s8 + $0xd0] sm:$0xff]  ;;  %v1198_v20 = vld [vmem:[%s2146_s8 + $0x98] sm:$0xff]  ;;  %v848_v29 = vld [vmem:[%s2146_s8 + $0x20] sm:$0xff] }
  0x61   : > { %750 = vmatpush.msra.mxu2 %v1184_v45  ;;  %771 = vmatpush.msra.mxu3 %v1706_v12  ;;  %v854_v12 = vld [vmem:[%s2146_s8 + $0x50] sm:$0xff] }
  0x62   : > { %787 = vmatpush.msrb.mxu0 %v1671_v7  ;;  %808 = vmatpush.msrb.mxu1 %v1189_v32  ;;  %v1204_v7 = vld [vmem:[%s2146_s8 + $0xc8] sm:$0xff]  ;;  %v847_v32 = vld [vmem:[%s2146_s8 + $0x18] sm:$0xff] }
  0x63   : > { %751 = vmatpush.msra.mxu2 %v1183_v46  ;;  %772 = vmatpush.msra.mxu3 %v1721_v14  ;;  %v853_v14 = vld [vmem:[%s2146_s8 + $0x48] sm:$0xff] }
  0x64   : > { %788 = vmatpush.msrb.mxu0 %v1685_v9  ;;  %809 = vmatpush.msrb.mxu1 %v1188_v35  ;;  %v1203_v9 = vld [vmem:[%s2146_s8 + $0xc0] sm:$0xff] }
  0x65   : > { %752 = vmatpush.msra.mxu2 %v1182_v47  ;;  %773 = vmatpush.msra.mxu3 %v1740_v17  ;;  %v1199_v17 = vld [vmem:[%s2146_s8 + $0xa0] sm:$0xff] }
  0x66   : > { %789 = vmatpush.msrb.mxu0 %v1699_v11  ;;  %810 = vmatpush.msrb.mxu1 %v1187_v39  ;;  %v1202_v11 = vld [vmem:[%s2146_s8 + $0xb8] sm:$0xff]  ;;  %v844_v35 = vld [vmem:[%s2146_s8] sm:$0xff] }
  0x67   : > { %753 = vmatpush.msra.mxu2 %v1181_v48  ;;  %774 = vmatpush.msra.mxu3 %v1754_v19  ;;  %v1226_v19 = vld [vmem:[%s2146_s8 + $0x178] sm:$0xff] }
  0x68   : > { %790 = vmatpush.msrb.mxu0 %v1714_v13  ;;  %811 = vmatpush.msrb.mxu1 %v1186_v42  ;;  %v1201_v13 = vld [vmem:[%s2146_s8 + $0xb0] sm:$0xff]  ;;  %v1218_v39 = vld [vmem:[%s2146_s8 + $0x138] sm:$0xff]  ;;  %v1215_v42 = vld [vmem:[%s2146_s8 + $0x120] sm:$0xff] }
  0x69   : > { %754 = vmatpush.msra.mxu2 %v1180_v49  ;;  %775 = vmatpush.msra.mxu3 %v1774_v24  ;;  %v1224_v24 = vld [vmem:[%s2146_s8 + $0x168] sm:$0xff] }
  0x6a   : > { %791 = vmatpush.msrb.mxu0 %v1728_v16  ;;  %812 = vmatpush.msrb.mxu1 %v1185_v44  ;;  %v852_v16 = vld [vmem:[%s2146_s8 + $0x40] sm:$0xff]  ;;  %v1213_v44 = vld [vmem:[%s2146_s8 + $0x110] sm:$0xff] }
  0x6b   : > { %755 = vmatpush.msra.mxu2 %v1179_v50  ;;  %776 = vmatpush.msra.mxu3 %v1789_v27  ;;  %v1223_v27 = vld [vmem:[%s2146_s8 + $0x160] sm:$0xff] }
  0x6c   : > { %792 = vmatpush.msrb.mxu0 %v1747_v18  ;;  %813 = vmatpush.msrb.mxu1 %v1184_v45  ;;  %v851_v18 = vld [vmem:[%s2146_s8 + $0x38] sm:$0xff]  ;;  %v1212_v45 = vld [vmem:[%s2146_s8 + $0x108] sm:$0xff] }
  0x6d   : > { %756 = vmatpush.msra.mxu2 %v1178_v51  ;;  %777 = vmatpush.msra.mxu3 %v1807_v30  ;;  %v1222_v30 = vld [vmem:[%s2146_s8 + $0x158] sm:$0xff] }
  0x6e   : > { %793 = vmatpush.msrb.mxu0 %v1765_v22  ;;  %814 = vmatpush.msrb.mxu1 %v1183_v46  ;;  %v850_v22 = vld [vmem:[%s2146_s8 + $0x30] sm:$0xff] }
  0x6f   : > { %757 = vmatpush.msra.mxu2 %v1177_v52  ;;  %778 = vmatpush.msra.mxu3 %v1823_v33  ;;  %v846_v33 = vld [vmem:[%s2146_s8 + $0x10] sm:$0xff] }
  0x70   : > { %794 = vmatpush.msrb.mxu0 %v1779_v25  ;;  %815 = vmatpush.msrb.mxu1 %v1182_v47  ;;  %v1197_v25 = vld [vmem:[%s2146_s8 + $0x90] sm:$0xff]  ;;  %v1211_v47 = vld [vmem:[%s2146_s8 + $0x100] sm:$0xff] }
  0x71   : > { %779 = vmatpush.msra.mxu3 %v1841_v37  ;;  %758 = vmatpush.msra.mxu2 %v1176_v53  ;;  %v1220_v37 = vld [vmem:[%s2146_s8 + $0x148] sm:$0xff] }
  0x72   : > { %795 = vmatpush.msrb.mxu0 %v1796_v28  ;;  %816 = vmatpush.msrb.mxu1 %v1181_v48  ;;  %v1196_v28 = vld [vmem:[%s2146_s8 + $0x88] sm:$0xff] }
  0x73   : > { %780 = vmatpush.msra.mxu3 %v1857_v40  ;;  %759 = vmatpush.msra.mxu2 %v1175_v54  ;;  %v1217_v40 = vld [vmem:[%s2146_s8 + $0x130] sm:$0xff] }
  0x74   : > { %796 = vmatpush.msrb.mxu0 %v1814_v31  ;;  %817 = vmatpush.msrb.mxu1 %v1180_v49  ;;  %v1195_v31 = vld [vmem:[%s2146_s8 + $0x80] sm:$0xff] }
  0x75   : > { %896 = vmatpush.msrb.mxu2 %v1210_v55  ;;  %916 = vmatpush.msrb.mxu3 %v1952_v57 }
  0x76   : > { %797 = vmatpush.msrb.mxu0 %v1830_v34  ;;  %818 = vmatpush.msrb.mxu1 %v1179_v50  ;;  %v845_v34 = vld [vmem:[%s2146_s8 + $0x8] sm:$0xff] }
  0x77   : > { %897 = vmatpush.msrb.mxu2 %v1209_v56  ;;  %917 = vmatpush.msrb.mxu3 %v1974_v4 }
  0x78   : > { %798 = vmatpush.msrb.mxu0 %v1846_v38  ;;  %819 = vmatpush.msrb.mxu1 %v1178_v51  ;;  %v1219_v38 = vld [vmem:[%s2146_s8 + $0x140] sm:$0xff] }
  0x79   : > { %898 = vmatpush.msrb.mxu2 %v1208_v58  ;;  %918 = vmatpush.msrb.mxu3 %v1983_v6 }
  0x7a   : > { %799 = vmatpush.msrb.mxu0 %v1864_v41  ;;  %820 = vmatpush.msrb.mxu1 %v1177_v52  ;;  %v1216_v41 = vld [vmem:[%s2146_s8 + $0x128] sm:$0xff] }
  0x7b   : > { %899 = vmatpush.msrb.mxu2 %v1207_v59  ;;  %919 = vmatpush.msrb.mxu3 %v1992_v8 }
  0x7c   : > { %800 = vmatpush.msrb.mxu0 %v1876_v43  ;;  %821 = vmatpush.msrb.mxu1 %v1176_v53  ;;  %v1214_v43 = vld [vmem:[%s2146_s8 + $0x118] sm:$0xff] }
  0x7d   : > { %900 = vmatpush.msrb.mxu2 %v1206_v3  ;;  %920 = vmatpush.msrb.mxu3 %v2001_v10 }
  0x7e   : > { %822 = vmatpush.msrb.mxu1 %v1175_v54 }
  0x7f   : > { %901 = vmatpush.msrb.mxu2 %v1205_v5  ;;  %921 = vmatpush.msrb.mxu3 %v854_v12 }
  0x81   : > { %902 = vmatpush.msrb.mxu2 %v1204_v7  ;;  %922 = vmatpush.msrb.mxu3 %v853_v14 }
  0x83   : > { %903 = vmatpush.msrb.mxu2 %v1203_v9  ;;  %923 = vmatpush.msrb.mxu3 %v852_v16 }
  0x85   : > { %904 = vmatpush.msrb.mxu2 %v1202_v11  ;;  %924 = vmatpush.msrb.mxu3 %v851_v18 }
  0x87   : > { %905 = vmatpush.msrb.mxu2 %v1201_v13  ;;  %925 = vmatpush.msrb.mxu3 %v850_v22 }
  0x89   : > { %906 = vmatpush.msrb.mxu2 %v1200_v15  ;;  %926 = vmatpush.msrb.mxu3 %v849_v26 }
  0x8b   : > { %907 = vmatpush.msrb.mxu2 %v1199_v17  ;;  %927 = vmatpush.msrb.mxu3 %v848_v29 }
  0x8d   : > { %908 = vmatpush.msrb.mxu2 %v1198_v20  ;;  %928 = vmatpush.msrb.mxu3 %v847_v32 }
  0x8f   : > { %909 = vmatpush.msrb.mxu2 %v1197_v25  ;;  %929 = vmatpush.msrb.mxu3 %v846_v33 }
  0x91   : > { %910 = vmatpush.msrb.mxu2 %v1196_v28  ;;  %930 = vmatpush.msrb.mxu3 %v845_v34 }
  0x93   : > { %911 = vmatpush.msrb.mxu2 %v1195_v31  ;;  %931 = vmatpush.msrb.mxu3 %v844_v35 }
  0x98   : > { %v440_v61 = vpop.f32.mrf.mxu0 }
  0x99   : > { %v469_v62 = vpop.f32.mrf.mxu1  ;;  %v441_v63 = vadd.f32 %v1245_v60, %v440_v61  ;;  %v1246_v61 = vld [vmem:[%s2144_s6] ss:$0 sm:$0xff] }
  0x9a   : > { %v470_v0 = vadd.f32 %v1245_v60, %v469_v62 }
  0x9b   : > { %720 = vmatmul.f32.vlgmr.msra.gmra.mxu0 %v441_v63  ;;  %v805_v2 = vrot.slane %v441_v63, 1 }
  0x9c   : > { %v702_v1 = vrot.slane %v470_v0, 7  ;;  %760 = vmatmul.f32.vlgmr.msra.gmra.mxu2 %v470_v0  ;;  %781 = vmatmul.f32.vlgmr.msra.gmra.mxu3 %v470_v0 }
  0x9d   : > { %936 = vmatpush.msra.mxu0 %v1226_v19  ;;  %977 = vmatpush.msra.mxu2 %v1952_v57 }
  0x9e   : > { %1192 = vmatmul.msk.f32.vlgmr.msra.gmra.mxu1 %vm1235_vm1, %v702_v1  ;;  %999 = vmatpush.msra.mxu3 %v1226_v19  ;;  %v1247_v1 = vld [vmem:[%s2145_s7] ss:$0 sm:$0xff] }
  0x9f   : > { %957 = vmatpush.msra.mxu1 %v1210_v55  ;;  %937 = vmatpush.msra.mxu0 %v1225_v23 }
  0xa0   : > { %978 = vmatpush.msra.mxu2 %v1974_v4  ;;  %1000 = vmatpush.msra.mxu3 %v1225_v23 }
  0xa1   : > { %958 = vmatpush.msra.mxu1 %v1209_v56  ;;  %938 = vmatpush.msra.mxu0 %v1224_v24 }
  0xa2   : > { %979 = vmatpush.msra.mxu2 %v1983_v6  ;;  %1001 = vmatpush.msra.mxu3 %v1224_v24 }
  0xa3   : > { %959 = vmatpush.msra.mxu1 %v1208_v58  ;;  %801 = vmatmul.f32.vlgmr.msrb.gmra.mxu0 %v441_v63 }
  0xa4   : > { %939 = vmatpush.msra.mxu0 %v1223_v27  ;;  %980 = vmatpush.msra.mxu2 %v1992_v8 }
  0xa5   : > { %960 = vmatpush.msra.mxu1 %v1207_v59  ;;  %1002 = vmatpush.msra.mxu3 %v1223_v27 }
  0xa6   : > { %1194 = vmatmul.msk.f32.vlgmr.msrb.gmra.mxu1 %vm1236_vm2, %v805_v2  ;;  %940 = vmatpush.msra.mxu0 %v1222_v30 }
  0xa7   : > { %961 = vmatpush.msra.mxu1 %v1206_v3  ;;  %981 = vmatpush.msra.mxu2 %v2001_v10 }
  0xa8   : > { %1003 = vmatpush.msra.mxu3 %v1222_v30  ;;  %941 = vmatpush.msra.mxu0 %v1221_v36 }
  0xa9   : > { %962 = vmatpush.msra.mxu1 %v1205_v5  ;;  %982 = vmatpush.msra.mxu2 %v854_v12 }
  0xaa   : > { %1004 = vmatpush.msra.mxu3 %v1221_v36  ;;  %942 = vmatpush.msra.mxu0 %v1220_v37 }
  0xab   : > { %963 = vmatpush.msra.mxu1 %v1204_v7  ;;  %983 = vmatpush.msra.mxu2 %v853_v14 }
  0xac   : > { %1005 = vmatpush.msra.mxu3 %v1220_v37  ;;  %943 = vmatpush.msra.mxu0 %v1219_v38 }
  0xad   : > { %964 = vmatpush.msra.mxu1 %v1203_v9  ;;  %984 = vmatpush.msra.mxu2 %v852_v16 }
  0xae   : > { %1006 = vmatpush.msra.mxu3 %v1219_v38  ;;  %944 = vmatpush.msra.mxu0 %v1218_v39 }
  0xaf   : > { %965 = vmatpush.msra.mxu1 %v1202_v11  ;;  %985 = vmatpush.msra.mxu2 %v851_v18  ;;  %v1248_v18 = vld [vmem:[%s2147_s9] ss:$0 sm:$0xff] }
  0xb0   : > { %1007 = vmatpush.msra.mxu3 %v1218_v39  ;;  %945 = vmatpush.msra.mxu0 %v1217_v40 }
  0xb1   : > { %966 = vmatpush.msra.mxu1 %v1201_v13  ;;  %986 = vmatpush.msra.mxu2 %v850_v22  ;;  %v1249_v22 = vld [vmem:[%s2148_s10] ss:$0 sm:$0xff] }
  0xb2   : > { %1008 = vmatpush.msra.mxu3 %v1217_v40  ;;  %946 = vmatpush.msra.mxu0 %v1216_v41 }
  0xb3   : > { %967 = vmatpush.msra.mxu1 %v1200_v15  ;;  %987 = vmatpush.msra.mxu2 %v849_v26 }
  0xb4   : > { %1009 = vmatpush.msra.mxu3 %v1216_v41  ;;  %947 = vmatpush.msra.mxu0 %v1215_v42 }
  0xb5   : > { %968 = vmatpush.msra.mxu1 %v1199_v17  ;;  %988 = vmatpush.msra.mxu2 %v848_v29 }
  0xb6   : > { %1010 = vmatpush.msra.mxu3 %v1215_v42  ;;  %948 = vmatpush.msra.mxu0 %v1214_v43 }
  0xb7   : > { %969 = vmatpush.msra.mxu1 %v1198_v20  ;;  %989 = vmatpush.msra.mxu2 %v847_v32 }
  0xb8   : > { %1011 = vmatpush.msra.mxu3 %v1214_v43  ;;  %949 = vmatpush.msra.mxu0 %v1213_v44 }
  0xb9   : > { %970 = vmatpush.msra.mxu1 %v1197_v25  ;;  %990 = vmatpush.msra.mxu2 %v846_v33 }
  0xba   : > { %1012 = vmatpush.msra.mxu3 %v1213_v44  ;;  %950 = vmatpush.msra.mxu0 %v1212_v45 }
  0xbb   : > { %971 = vmatpush.msra.mxu1 %v1196_v28  ;;  %991 = vmatpush.msra.mxu2 %v845_v34 }
  0xbc   : > { %1013 = vmatpush.msra.mxu3 %v1212_v45  ;;  %951 = vmatpush.msra.mxu0 %v1211_v47 }
  0xbd   : > { %972 = vmatpush.msra.mxu1 %v1195_v31  ;;  %992 = vmatpush.msra.mxu2 %v844_v35 }
  0xbe   : > { %1014 = vmatpush.msra.mxu3 %v1211_v47 }
  0xd0   : > { %v544_v46 = vpop.f32.mrf.mxu2 }
  0xd3   : > { %v564_v48 = vpop.f32.mrf.mxu3 }
  0xd4   : > { %v565_v55 = vadd.f32 %v564_v48, %v544_v46 }
  0xd9   : > { %v584_v49 = vpop.f32.mrf.mxu0 }
  0xda   : > { %v625_v51 = vpop.f32.mrf.mxu2  ;;  %v587_v58 = vadd.f32 %v584_v49, %v565_v55 }
  0xdc   : > { %v605_v50 = vpop.f32.mrf.mxu1  ;;  %v648_v52 = vpop.f32.mrf.mxu3 }
  0xdd   : > { %v626_v59 = vadd.f32 %v625_v51, %v605_v50 }
  0xdf   : > { %v651_v4 = vadd.f32 %v648_v52, %v626_v59 }
 0x118   : > { %v721_v53 = vpop.f32.mrf.mxu0 }
 0x11b   : > { %v741_v54 = vpop.f32.mrf.mxu1 }
 0x11c   : > { %v742_v56 = vadd.f32 %v741_v54, %v721_v53 }
 0x11f   : > { %v761_v57 = vpop.f32.mrf.mxu2  ;;  %v782_v62 = vpop.f32.mrf.mxu3 }
 0x120   : > { %v764_v60 = vadd.f32 %v761_v57, %v742_v56  ;;  %v802_v63 = vpop.f32.mrf.mxu0 }
 0x121   : > { %v803_v2 = vadd.f32 %v802_v63, %v782_v62 }
 0x122   : > { %v830_v0 = vadd.f32 %v764_v60, %v587_v58 }
 0x123   : > { %v824_v3 = vpop.f32.mrf.mxu1 }
 0x124   : > { %v834_v5 = vmul.f32 %v1246_v61, %v830_v0  ;;  %v827_v6 = vadd.f32 %v824_v3, %v803_v2 }
 0x126   : > { %v838_v7 = vadd.f32 %v1247_v1, %v834_v5  ;;  %v840_v8 = vadd.f32 %v827_v6, %v651_v4 }
 0x128   : > { %v839_v9 = vmax.f32 %v838_v7, 0.0  ;;  %v841_v10 = vmul.f32 %v1246_v61, %v840_v8 }
 0x12a   : > { %v842_v11 = vadd.f32 %v1247_v1, %v841_v10  ;;  %912 = vmatmul.f32.vlgmr.msrb.gmra.mxu2 %v839_v9  ;;  %v997_v14 = vrot.slane %v839_v9, 1 }
 0x12c   : > { %v843_v12 = vmax.f32 %v842_v11, 0.0 }
 0x12e   : > { %v894_v13 = vrot.slane %v843_v12, 7  ;;  %952 = vmatmul.f32.vlgmr.msra.gmra.mxu0 %v843_v12  ;;  %973 = vmatmul.f32.vlgmr.msra.gmra.mxu1 %v843_v12 }
 0x130   : > { %1228 = vmatmul.msk.f32.vlgmr.msrb.gmra.mxu3 %vm1235_vm1, %v894_v13 }
 0x132   : > { %993 = vmatmul.f32.vlgmr.msra.gmra.mxu2 %v839_v9 }
 0x138   : > { %1230 = vmatmul.msk.f32.vlgmr.msra.gmra.mxu3 %vm1236_vm2, %v997_v14 }
 0x1ab   : > { %v953_v19 = vpop.f32.mrf.mxu0  ;;  %v974_v25 = vpop.f32.mrf.mxu1 }
 0x1ad   : > { %v913_v15 = vpop.f32.mrf.mxu2 }
 0x1b3   : > { %v933_v16 = vpop.f32.mrf.mxu3 }
 0x1b4   : > { %v934_v17 = vadd.f32 %v933_v16, %v913_v15 }
 0x1b5   : > { %v994_v23 = vpop.f32.mrf.mxu2 }
 0x1b6   : > { %v956_v20 = vadd.f32 %v953_v19, %v934_v17  ;;  %v995_v27 = vadd.f32 %v994_v23, %v974_v25 }
 0x1b8   : > { %v1025_v24 = vmul.f32 %v1248_v18, %v956_v20 }
 0x1ba   : > { %v1029_v26 = vadd.f32 %v1249_v22, %v1025_v24 }
 0x1bb   : > { %v1016_v21 = vpop.f32.mrf.mxu3 }
 0x1bc   : > { %v1030_v28 = vmax.f32 %v1029_v26, 0.0  ;;  %v1019_v29 = vadd.f32 %v1016_v21, %v995_v27 }
 0x1be   : > { %1031 = vst [vmem:[%s403_s12] sm:$0xff] %v1030_v28  ;;  %v1032_v30 = vmul.f32 %v1248_v18, %v1019_v29 }
 0x1c0   : > { %v1033_v31 = vadd.f32 %v1249_v22, %v1032_v30 }
 0x1c2   : > { %v1034_v32 = vmax.f32 %v1033_v31, 0.0 }
 0x1c4   : > { %1035 = vst [vmem:[%s403_s12 + $0x8] sm:$0xff] %v1034_v32 }
 0x1c5 PF: > { %s21_s17 = sadd.s32 1, %s1256_s17  }
 0x1c6   : > { %p18_p4 = scmp.ge.s32.totalorder %s21_s17, 4  }
 0x1c8   :  { %20 = sbr.rel (!%p18_p4) target bundleno = 1 (0x1), region = 104 }

</bundles_post_ra>
